<compile_context>
chip_gen: v7x
topology: tpu7x:2x2x1
jax: 0.10.0
libtpu: 0.0.40
codegen_flags: <defaults>
</compile_context>

<pallas_src>
import jax
import jax.numpy as jnp
from jax.experimental import pallas as pl
from jax.experimental.pallas import tpu as pltpu

# ---------------- model hyperparameters (small, consistent with the module) ---------
B = 2          # batch
S = 8          # sequence length
H = 32         # hidden_size
D = 16         # head_dim
NH = 4         # num_attention_heads
NKV = 2        # num_kv_heads
GROUPS = NH // NKV
I = 64         # intermediate_size
EPS = 1e-6

QKN = NH * D + NKV * D          # 96  : packed [q | k] width
QKV_COLS = 2 * QKN + NKV * D    # 224 : packed [q | k | q_rot | k_rot | v] width


def _rms_norm(x, w, eps):
    # matches the torch "LayerNorm" (RMSNorm, no mean subtraction)
    var = jnp.mean(x * x, axis=-1, keepdims=True)
    return w * (x * jax.lax.rsqrt(var + eps))


def decoder_layer_kernel(
    x_ref,        # (1, S, H)        f32   per-batch token block
    rope_ref,     # (1, S, 2*QKN)    f32   [cos*norm_w | sin*swap(norm_w)] multipliers
    ln_ref,       # (2, H)           f32   [input_layernorm ; post_attention_layernorm]
    wqkv_ref,     # (H, QKV_COLS)    bf16  [Wq | Wk | Wq_rot | Wk_rot | Wv]
    mnorm_ref,    # (QKN, QKN)       bf16  block-diag per-head 1/D averaging matrix
    wo_ref,       # (NH*D, H)        bf16
    wgu_ref,      # (H, 2*I)         bf16  [Wgate | Wup]
    wd_ref,       # (I, H)           bf16
    o_ref,        # (1, S, H)        f32
):
    x = x_ref[0]                                            # (S, H) f32

    # ---------------- input RMSNorm ----------------
    xn = _rms_norm(x, ln_ref[0:1, :], EPS)
    xnb = xn.astype(jnp.bfloat16)

    # ---------------- fused q/k/qrot/krot/v projection (one MXU dispatch) ------------
    qkv = jnp.dot(xnb, wqkv_ref[...], preferred_element_type=jnp.float32)   # (S, 224)
    qk = qkv[:, :QKN]                 # [q | k]             (S, 96)
    qkr = qkv[:, QKN:2 * QKN]         # [rot(q) | rot(k)]   (S, 96)
    v = qkv[:, 2 * QKN:]              # (S, NKV*D)

    # per-head RMS factors (q_norm / k_norm) via one block-diagonal bf16 averaging matmul
    qk_sq = (qk * qk).astype(jnp.bfloat16)
    rqk = jax.lax.rsqrt(
        jnp.dot(qk_sq, mnorm_ref[...], preferred_element_type=jnp.float32) + EPS)

    # RoPE + q/k norm, whole-slab (norm weights & cos/sin pre-folded into the rope slab)
    rope = rope_ref[0]                                      # (S, 192)
    qk_rope = rqk * (qk * rope[:, :QKN] + qkr * rope[:, QKN:])
    q_rope = qk_rope[:, :NH * D].astype(jnp.bfloat16)       # (S, NH*D)
    k_rope = qk_rope[:, NH * D:].astype(jnp.bfloat16)       # (S, NKV*D)
    v_b = v.astype(jnp.bfloat16)

    # ---------------- causal attention (one batch element per grid step) -------------
    row = jax.lax.broadcasted_iota(jnp.int32, (S, S), 0)
    col = jax.lax.broadcasted_iota(jnp.int32, (S, S), 1)
    mask = col <= row

    scale = D ** -0.5
    ctx_heads = []
    for h in range(NH):                                     # static small-head loop
        kv = h // GROUPS
        q_h = q_rope[:, h * D:(h + 1) * D]                  # (S, D)
        k_h = k_rope[:, kv * D:(kv + 1) * D]                # (S, D)
        v_h = v_b[:, kv * D:(kv + 1) * D]                   # (S, D)

        s = jax.lax.dot_general(q_h, k_h, (((1,), (1,)), ((), ())),
                                preferred_element_type=jnp.float32) * scale
        s = jnp.where(mask, s, -1e30)                       # keep mask/softmax in f32
        s = s - jnp.max(s, axis=-1, keepdims=True)
        p = jnp.exp(s)
        p = p * pl.reciprocal(jnp.sum(p, axis=-1, keepdims=True), approx=True)
        ctx_heads.append(jnp.dot(p.astype(jnp.bfloat16), v_h,
                                 preferred_element_type=jnp.float32))

    # single K=NH*D Wo matmul instead of NH K=D matmuls + adds
    ctx = jnp.concatenate(ctx_heads, axis=-1).astype(jnp.bfloat16)          # (S, NH*D)
    attn_out = jnp.dot(ctx, wo_ref[...], preferred_element_type=jnp.float32)

    x2 = attn_out + x                                       # residual 1

    # ---------------- MLP (SwiGLU), fused gate/up matmul -----------------------------
    xn2 = _rms_norm(x2, ln_ref[1:2, :], EPS)
    xn2b = xn2.astype(jnp.bfloat16)
    gu = jnp.dot(xn2b, wgu_ref[...], preferred_element_type=jnp.float32)    # (S, 2I)
    gate = gu[:, :I]
    up = gu[:, I:]
    gated = (gate * jax.nn.sigmoid(gate)) * up              # SiLU(gate) * up, f32
    mlp_out = jnp.dot(gated.astype(jnp.bfloat16), wd_ref[...],
                      preferred_element_type=jnp.float32)                    # (S, H)

    o_ref[0] = mlp_out + x2                                 # residual 2


# ---------------- one-time parameter preparation (hoisted out of the per-call jit) ---
def prepare_params(params):
    (in_ln_w, wq, wk, wv, qn_w, kn_w, wo, post_ln_w, wg, wu, wd) = params

    def rot_cols(w, n_heads):
        # fold per-head rotate_half (incl. sign) into the projection's output columns:
        # (xn @ rot_cols(W))[:, hD:(h+1)D] == rotate_half((xn @ W)[:, hD:(h+1)D])
        w3 = w.reshape(w.shape[0], n_heads, D)
        return jnp.concatenate([-w3[..., D // 2:], w3[..., :D // 2]],
                               axis=-1).reshape(w.shape[0], n_heads * D)

    def swap_halves(w):          # |rotate_half| permutation of a per-head norm weight
        return jnp.concatenate([w[..., D // 2:], w[..., :D // 2]], axis=-1)

    bf = lambda a: a.astype(jnp.bfloat16)

    # packed projection weight: columns = [q | k | rot(q) | rot(k) | v]
    w_qkv = bf(jnp.concatenate(
        [wq, wk, rot_cols(wq, NH), rot_cols(wk, NKV), wv], axis=1))          # (H, 224)

    ln_w = jnp.concatenate([in_ln_w, post_ln_w], axis=0)                     # (2, H)

    # block-diagonal per-head averaging matrix for q_norm/k_norm RMS (q heads then k heads)
    m_norm = bf(jnp.kron(jnp.eye(NH + NKV, dtype=jnp.float32),
                         jnp.full((D, D), 1.0 / D, jnp.float32)))            # (96, 96)

    w_gu = bf(jnp.concatenate([wg, wu], axis=1))                             # (H, 2I)
    wo_b = bf(wo)
    wd_b = bf(wd)

    # tiny per-head norm-weight multipliers, laid out to match the [q | k] packing
    cosmul = jnp.concatenate([jnp.tile(qn_w, (1, NH)),
                              jnp.tile(kn_w, (1, NKV))], axis=-1)            # (1, 96)
    sinmul = jnp.concatenate([jnp.tile(swap_halves(qn_w), (1, NH)),
                              jnp.tile(swap_halves(kn_w), (1, NKV))], axis=-1)

    return (ln_w, w_qkv, m_norm, wo_b, w_gu, wd_b, cosmul, sinmul)


@jax.jit
def decoder_layer(x, cos, sin, prep):
    (ln_w, w_qkv, m_norm, wo_b, w_gu, wd_b, cosmul, sinmul) = prep

    # token-sized per-call precompute: RoPE multiplier slab [cos*norm | sin*swap(norm)]
    cos_t = jnp.concatenate([jnp.tile(cos, (1, 1, NH)),
                             jnp.tile(cos, (1, 1, NKV))], axis=-1)           # (B, S, 96)
    sin_t = jnp.concatenate([jnp.tile(sin, (1, 1, NH)),
                             jnp.tile(sin, (1, 1, NKV))], axis=-1)
    rope = jnp.concatenate([cos_t * cosmul, sin_t * sinmul], axis=-1)        # (B, S, 192)

    grid_spec = pltpu.PrefetchScalarGridSpec(
        num_scalar_prefetch=0,
        grid=(B,),     # one sequence per step; "parallel" -> split across v7x's 2 TCs
        in_specs=[
            pl.BlockSpec((1, S, H), lambda b: (b, 0, 0)),          # x streams per batch
            pl.BlockSpec((1, S, 2 * QKN), lambda b: (b, 0, 0)),    # rope slab per batch
            # constant index_maps: weights stay resident, DMA'd once
            # (at real sizes: add pipeline_mode=pl.Buffered(1) + contraction tiling)
            pl.BlockSpec((2, H), lambda b: (0, 0)),                # ln weights
            pl.BlockSpec((H, QKV_COLS), lambda b: (0, 0)),         # packed qkv weights
            pl.BlockSpec((QKN, QKN), lambda b: (0, 0)),            # norm averaging mat
            pl.BlockSpec((NH * D, H), lambda b: (0, 0)),           # wo
            pl.BlockSpec((H, 2 * I), lambda b: (0, 0)),            # packed gate/up
            pl.BlockSpec((I, H), lambda b: (0, 0)),                # w_down
        ],
        out_specs=pl.BlockSpec((1, S, H), lambda b: (b, 0, 0)),
    )
    out = pl.pallas_call(
        decoder_layer_kernel,
        out_shape=jax.ShapeDtypeStruct((B, S, H), jnp.float32),
        grid_spec=grid_spec,
        compiler_params=pltpu.CompilerParams(
            dimension_semantics=("parallel",),
            vmem_limit_bytes=64 * 1024 * 1024),
    )(x, rope, ln_w, w_qkv, m_norm, wo_b, w_gu, wd_b)
    return out


# -------------------------- pure-JAX reference (for verification) -------------------
def reference(x, cos, sin, params):
    (in_ln_w, wq, wk, wv, qn_w, kn_w, wo, post_ln_w, wg, wu, wd) = params
    rms = lambda t, w: w.reshape(-1) * (t * jax.lax.rsqrt(
        jnp.mean(t * t, axis=-1, keepdims=True) + EPS))

    residual = x
    xn = rms(x, in_ln_w)
    q = (xn @ wq).reshape(B, S, NH, D).transpose(0, 2, 1, 3)
    k = (xn @ wk).reshape(B, S, NKV, D).transpose(0, 2, 1, 3)
    v = (xn @ wv).reshape(B, S, NKV, D).transpose(0, 2, 1, 3)
    q = rms(q, qn_w)
    k = rms(k, kn_w)

    c = cos[:, None, :, :]
    s = sin[:, None, :, :]
    rot = lambda t: jnp.concatenate([-t[..., D // 2:], t[..., :D // 2]], axis=-1)
    q = q * c + rot(q) * s
    k = k * c + rot(k) * s

    k = jnp.repeat(k, GROUPS, axis=1)
    v = jnp.repeat(v, GROUPS, axis=1)

    scores = jnp.einsum("bhqd,bhkd->bhqk", q, k) * (D ** -0.5)
    mask = jnp.tril(jnp.ones((S, S), bool))
    scores = jnp.where(mask, scores, -1e30)
    p = jax.nn.softmax(scores, axis=-1)
    attn = jnp.einsum("bhqk,bhkd->bhqd", p, v).transpose(0, 2, 1, 3).reshape(B, S, NH * D)
    x2 = attn @ wo + residual

    residual2 = x2
    xn2 = rms(x2, post_ln_w)
    mlp = (jax.nn.silu(xn2 @ wg) * (xn2 @ wu)) @ wd
    return mlp + residual2


if __name__ == "__main__":
    key = jax.random.PRNGKey(0)
    keys = jax.random.split(key, 8)

    x = jax.random.normal(keys[0], (B, S, H), jnp.float32)

    # RoPE position embeddings (standard: cos/sin of shape (B, S, head_dim))
    inv_freq = 1.0 / (10000.0 ** (jnp.arange(0, D, 2, dtype=jnp.float32) / D))
    pos = jnp.arange(S, dtype=jnp.float32)
    freqs = pos[:, None] * inv_freq[None, :]                      # (S, D/2)
    emb = jnp.concatenate([freqs, freqs], axis=-1)                # (S, D)
    cos = jnp.broadcast_to(jnp.cos(emb), (B, S, D)).astype(jnp.float32)
    sin = jnp.broadcast_to(jnp.sin(emb), (B, S, D)).astype(jnp.float32)

    # deterministic synthetic parameters (norm weights = ones, as in torch __init__)
    init = lambda k, shape: (0.02 * jax.random.normal(k, shape)).astype(jnp.float32)
    params = (
        jnp.ones((1, H), jnp.float32),        # input_layernorm
        init(keys[1], (H, NH * D)),           # q_proj (transposed: in, out)
        init(keys[2], (H, NKV * D)),          # k_proj
        init(keys[3], (H, NKV * D)),          # v_proj
        jnp.ones((1, D), jnp.float32),        # q_norm
        jnp.ones((1, D), jnp.float32),        # k_norm
        init(keys[4], (NH * D, H)),           # o_proj
        jnp.ones((1, H), jnp.float32),        # post_attention_layernorm
        init(keys[5], (H, I)),                # gate_proj
        init(keys[6], (H, I)),                # up_proj
        init(keys[7], (I, H)),                # down_proj
    )

    # one-time (per-weight-update) preparation; the jitted forward only sees packed arrays
    prep = prepare_params(params)

    out = decoder_layer(x, cos, sin, prep)
    out = jax.block_until_ready(out)

    ref = reference(x, cos, sin, params)
    assert out.shape == (B, S, H)
    # bf16 matmul operands + approx reciprocal -> slightly looser tolerance vs f32 ref
    assert jnp.allclose(out, ref, rtol=1e-2, atol=1e-2), (
        float(jnp.max(jnp.abs(out - ref))))

    print("KERNEL_OK")
</pallas_src>

<mosaic_0001>
module attributes {stable_mosaic.version = 11 : i64} {
  func.func @decoder_layer_kernel(%arg0: i32, %arg1: memref<1x8x32xf32, #tpu.memory_space<vmem>>, %arg2: memref<1x8x192xf32, #tpu.memory_space<vmem>>, %arg3: memref<2x32xf32, #tpu.memory_space<vmem>>, %arg4: memref<32x224xbf16, #tpu.memory_space<vmem>>, %arg5: memref<96x96xbf16, #tpu.memory_space<vmem>>, %arg6: memref<64x32xbf16, #tpu.memory_space<vmem>>, %arg7: memref<32x128xbf16, #tpu.memory_space<vmem>>, %arg8: memref<64x32xbf16, #tpu.memory_space<vmem>>, %arg9: memref<1x8x32xf32, #tpu.memory_space<vmem>>) attributes {dimension_semantics = [#tpu.dimension_semantics<parallel>], iteration_bounds = array<i64: 2>, scalar_prefetch = 0 : i64, scratch_operands = 0 : i64, tpu.core_type = #tpu.core_type<tc>, window_params = [{transform_indices = @transform_0, window_bounds = array<i64: 1, 8, 32>}, {transform_indices = @transform_1, window_bounds = array<i64: 1, 8, 192>}, {pipeline_mode = #tpu.pipeline_mode<synchronous>, transform_indices = @transform_2, window_bounds = array<i64: 2, 32>}, {pipeline_mode = #tpu.pipeline_mode<synchronous>, transform_indices = @transform_3, window_bounds = array<i64: 32, 224>}, {pipeline_mode = #tpu.pipeline_mode<synchronous>, transform_indices = @transform_4, window_bounds = array<i64: 96, 96>}, {pipeline_mode = #tpu.pipeline_mode<synchronous>, transform_indices = @transform_5, window_bounds = array<i64: 64, 32>}, {pipeline_mode = #tpu.pipeline_mode<synchronous>, transform_indices = @transform_6, window_bounds = array<i64: 32, 128>}, {pipeline_mode = #tpu.pipeline_mode<synchronous>, transform_indices = @transform_7, window_bounds = array<i64: 64, 32>}, {transform_indices = @transform_8, window_bounds = array<i64: 1, 8, 32>}]} {
    %c0 = arith.constant 0 : index
    %c0_0 = arith.constant 0 : index
    %c0_1 = arith.constant 0 : index
    %0 = vector.load %arg1[%c0, %c0_0, %c0_1] : memref<1x8x32xf32, #tpu.memory_space<vmem>>, vector<1x8x32xf32>
    %1 = vector.shape_cast %0 : vector<1x8x32xf32> to vector<8x32xf32>
    %c0_2 = arith.constant 0 : index
    %c0_3 = arith.constant 0 : index
    %2 = vector.load %arg3[%c0_2, %c0_3] : memref<2x32xf32, #tpu.memory_space<vmem>>, vector<1x32xf32>
    %3 = arith.mulf %1, %1 : vector<8x32xf32>
    %cst = arith.constant dense<0.000000e+00> : vector<8xf32>
    %4 = vector.multi_reduction <add>, %3, %cst [1] : vector<8x32xf32> to vector<8xf32>
    %5 = vector.shape_cast %4 : vector<8xf32> to vector<8x1xf32>
    %cst_4 = arith.constant 3.200000e+01 : f32
    %6 = vector.broadcast %cst_4 : f32 to vector<8x1xf32>
    %7 = arith.divf %5, %6 : vector<8x1xf32>
    %cst_5 = arith.constant 9.99999997E-7 : f32
    %8 = vector.broadcast %cst_5 : f32 to vector<8x1xf32>
    %9 = arith.addf %7, %8 : vector<8x1xf32>
    %10 = math.rsqrt %9 : vector<8x1xf32>
    %11 = vector.broadcast %10 : vector<8x1xf32> to vector<8x32xf32>
    %12 = arith.mulf %1, %11 : vector<8x32xf32>
    %13 = vector.broadcast %2 : vector<1x32xf32> to vector<8x32xf32>
    %14 = arith.mulf %13, %12 : vector<8x32xf32>
    %15 = arith.truncf %14 : vector<8x32xf32> to vector<8x32xbf16>
    %c0_6 = arith.constant 0 : index
    %c0_7 = arith.constant 0 : index
    %16 = vector.load %arg4[%c0_6, %c0_7] : memref<32x224xbf16, #tpu.memory_space<vmem>>, vector<32x224xbf16>
    %cst_8 = arith.constant dense<0.000000e+00> : vector<8x224xf32>
    %17 = tpu.matmul %15, %16, %cst_8 {dimension_numbers = #tpu.dot_dimension_numbers<[1], [0], [0], [1], [0, 0, 1, 1], [], []>} : vector<8x32xbf16>, vector<32x224xbf16>, vector<8x224xf32> -> vector<8x224xf32>
    %18 = vector.extract_strided_slice %17 {offsets = [0, 0], sizes = [8, 96], strides = [1, 1]} : vector<8x224xf32> to vector<8x96xf32>
    %19 = vector.extract_strided_slice %17 {offsets = [0, 96], sizes = [8, 96], strides = [1, 1]} : vector<8x224xf32> to vector<8x96xf32>
    %20 = vector.extract_strided_slice %17 {offsets = [0, 192], sizes = [8, 32], strides = [1, 1]} : vector<8x224xf32> to vector<8x32xf32>
    %21 = arith.mulf %18, %18 : vector<8x96xf32>
    %22 = arith.truncf %21 : vector<8x96xf32> to vector<8x96xbf16>
    %c0_9 = arith.constant 0 : index
    %c0_10 = arith.constant 0 : index
    %23 = vector.load %arg5[%c0_9, %c0_10] : memref<96x96xbf16, #tpu.memory_space<vmem>>, vector<96x96xbf16>
    %cst_11 = arith.constant dense<0.000000e+00> : vector<8x96xf32>
    %24 = tpu.matmul %22, %23, %cst_11 {dimension_numbers = #tpu.dot_dimension_numbers<[1], [0], [0], [1], [0, 0, 1, 1], [], []>} : vector<8x96xbf16>, vector<96x96xbf16>, vector<8x96xf32> -> vector<8x96xf32>
    %cst_12 = arith.constant 9.99999997E-7 : f32
    %25 = vector.broadcast %cst_12 : f32 to vector<8x96xf32>
    %26 = arith.addf %24, %25 : vector<8x96xf32>
    %27 = math.rsqrt %26 : vector<8x96xf32>
    %c0_13 = arith.constant 0 : index
    %c0_14 = arith.constant 0 : index
    %c0_15 = arith.constant 0 : index
    %28 = vector.load %arg2[%c0_13, %c0_14, %c0_15] : memref<1x8x192xf32, #tpu.memory_space<vmem>>, vector<1x8x192xf32>
    %29 = vector.shape_cast %28 : vector<1x8x192xf32> to vector<8x192xf32>
    %30 = vector.extract_strided_slice %29 {offsets = [0, 0], sizes = [8, 96], strides = [1, 1]} : vector<8x192xf32> to vector<8x96xf32>
    %31 = arith.mulf %18, %30 : vector<8x96xf32>
    %32 = vector.extract_strided_slice %29 {offsets = [0, 96], sizes = [8, 96], strides = [1, 1]} : vector<8x192xf32> to vector<8x96xf32>
    %33 = arith.mulf %19, %32 : vector<8x96xf32>
    %34 = arith.addf %31, %33 : vector<8x96xf32>
    %35 = arith.mulf %27, %34 : vector<8x96xf32>
    %36 = vector.extract_strided_slice %35 {offsets = [0, 0], sizes = [8, 64], strides = [1, 1]} : vector<8x96xf32> to vector<8x64xf32>
    %37 = arith.truncf %36 : vector<8x64xf32> to vector<8x64xbf16>
    %38 = vector.extract_strided_slice %35 {offsets = [0, 64], sizes = [8, 32], strides = [1, 1]} : vector<8x96xf32> to vector<8x32xf32>
    %39 = arith.truncf %38 : vector<8x32xf32> to vector<8x32xbf16>
    %40 = arith.truncf %20 : vector<8x32xf32> to vector<8x32xbf16>
    %41 = tpu.iota {dimensions = array<i32: 0>} : vector<8x8xi32>
    %42 = tpu.iota {dimensions = array<i32: 1>} : vector<8x8xi32>
    %43 = arith.cmpi sle, %42, %41 : vector<8x8xi32>
    %44 = vector.extract_strided_slice %37 {offsets = [0, 0], sizes = [8, 16], strides = [1, 1]} : vector<8x64xbf16> to vector<8x16xbf16>
    %45 = vector.extract_strided_slice %39 {offsets = [0, 0], sizes = [8, 16], strides = [1, 1]} : vector<8x32xbf16> to vector<8x16xbf16>
    %46 = vector.extract_strided_slice %40 {offsets = [0, 0], sizes = [8, 16], strides = [1, 1]} : vector<8x32xbf16> to vector<8x16xbf16>
    %cst_16 = arith.constant dense<0.000000e+00> : vector<8x8xf32>
    %47 = tpu.matmul %44, %45, %cst_16 {dimension_numbers = #tpu.dot_dimension_numbers<[1], [1], [0], [0], [0, 0, 1, 0], [], []>} : vector<8x16xbf16>, vector<8x16xbf16>, vector<8x8xf32> -> vector<8x8xf32>
    %cst_17 = arith.constant 2.500000e-01 : f32
    %48 = vector.broadcast %cst_17 : f32 to vector<8x8xf32>
    %49 = arith.mulf %47, %48 : vector<8x8xf32>
    %cst_18 = arith.constant -1.000000e+30 : f32
    %50 = vector.broadcast %cst_18 : f32 to vector<8x8xf32>
    %51 = arith.select %43, %49, %50 : vector<8x8xi1>, vector<8x8xf32>
    %cst_19 = arith.constant dense<0xFF800000> : vector<8xf32>
    %52 = vector.multi_reduction <maximumf>, %51, %cst_19 [1] : vector<8x8xf32> to vector<8xf32>
    %53 = vector.shape_cast %52 : vector<8xf32> to vector<8x1xf32>
    %54 = vector.broadcast %53 : vector<8x1xf32> to vector<8x8xf32>
    %55 = arith.subf %51, %54 : vector<8x8xf32>
    %56 = math.exp %55 : vector<8x8xf32>
    %cst_20 = arith.constant dense<0.000000e+00> : vector<8xf32>
    %57 = vector.multi_reduction <add>, %56, %cst_20 [1] : vector<8x8xf32> to vector<8xf32>
    %58 = vector.shape_cast %57 : vector<8xf32> to vector<8x1xf32>
    %59 = tpu.reciprocal %58 {approx = true} : vector<8x1xf32> -> vector<8x1xf32>
    %60 = vector.broadcast %59 : vector<8x1xf32> to vector<8x8xf32>
    %61 = arith.mulf %56, %60 : vector<8x8xf32>
    %62 = arith.truncf %61 : vector<8x8xf32> to vector<8x8xbf16>
    %cst_21 = arith.constant dense<0.000000e+00> : vector<8x16xf32>
    %63 = tpu.matmul %62, %46, %cst_21 {dimension_numbers = #tpu.dot_dimension_numbers<[1], [0], [0], [1], [0, 0, 1, 1], [], []>} : vector<8x8xbf16>, vector<8x16xbf16>, vector<8x16xf32> -> vector<8x16xf32>
    %64 = vector.extract_strided_slice %37 {offsets = [0, 16], sizes = [8, 16], strides = [1, 1]} : vector<8x64xbf16> to vector<8x16xbf16>
    %65 = vector.extract_strided_slice %39 {offsets = [0, 0], sizes = [8, 16], strides = [1, 1]} : vector<8x32xbf16> to vector<8x16xbf16>
    %66 = vector.extract_strided_slice %40 {offsets = [0, 0], sizes = [8, 16], strides = [1, 1]} : vector<8x32xbf16> to vector<8x16xbf16>
    %cst_22 = arith.constant dense<0.000000e+00> : vector<8x8xf32>
    %67 = tpu.matmul %64, %65, %cst_22 {dimension_numbers = #tpu.dot_dimension_numbers<[1], [1], [0], [0], [0, 0, 1, 0], [], []>} : vector<8x16xbf16>, vector<8x16xbf16>, vector<8x8xf32> -> vector<8x8xf32>
    %cst_23 = arith.constant 2.500000e-01 : f32
    %68 = vector.broadcast %cst_23 : f32 to vector<8x8xf32>
    %69 = arith.mulf %67, %68 : vector<8x8xf32>
    %cst_24 = arith.constant -1.000000e+30 : f32
    %70 = vector.broadcast %cst_24 : f32 to vector<8x8xf32>
    %71 = arith.select %43, %69, %70 : vector<8x8xi1>, vector<8x8xf32>
    %cst_25 = arith.constant dense<0xFF800000> : vector<8xf32>
    %72 = vector.multi_reduction <maximumf>, %71, %cst_25 [1] : vector<8x8xf32> to vector<8xf32>
    %73 = vector.shape_cast %72 : vector<8xf32> to vector<8x1xf32>
    %74 = vector.broadcast %73 : vector<8x1xf32> to vector<8x8xf32>
    %75 = arith.subf %71, %74 : vector<8x8xf32>
    %76 = math.exp %75 : vector<8x8xf32>
    %cst_26 = arith.constant dense<0.000000e+00> : vector<8xf32>
    %77 = vector.multi_reduction <add>, %76, %cst_26 [1] : vector<8x8xf32> to vector<8xf32>
    %78 = vector.shape_cast %77 : vector<8xf32> to vector<8x1xf32>
    %79 = tpu.reciprocal %78 {approx = true} : vector<8x1xf32> -> vector<8x1xf32>
    %80 = vector.broadcast %79 : vector<8x1xf32> to vector<8x8xf32>
    %81 = arith.mulf %76, %80 : vector<8x8xf32>
    %82 = arith.truncf %81 : vector<8x8xf32> to vector<8x8xbf16>
    %cst_27 = arith.constant dense<0.000000e+00> : vector<8x16xf32>
    %83 = tpu.matmul %82, %66, %cst_27 {dimension_numbers = #tpu.dot_dimension_numbers<[1], [0], [0], [1], [0, 0, 1, 1], [], []>} : vector<8x8xbf16>, vector<8x16xbf16>, vector<8x16xf32> -> vector<8x16xf32>
    %84 = vector.extract_strided_slice %37 {offsets = [0, 32], sizes = [8, 16], strides = [1, 1]} : vector<8x64xbf16> to vector<8x16xbf16>
    %85 = vector.extract_strided_slice %39 {offsets = [0, 16], sizes = [8, 16], strides = [1, 1]} : vector<8x32xbf16> to vector<8x16xbf16>
    %86 = vector.extract_strided_slice %40 {offsets = [0, 16], sizes = [8, 16], strides = [1, 1]} : vector<8x32xbf16> to vector<8x16xbf16>
    %cst_28 = arith.constant dense<0.000000e+00> : vector<8x8xf32>
    %87 = tpu.matmul %84, %85, %cst_28 {dimension_numbers = #tpu.dot_dimension_numbers<[1], [1], [0], [0], [0, 0, 1, 0], [], []>} : vector<8x16xbf16>, vector<8x16xbf16>, vector<8x8xf32> -> vector<8x8xf32>
    %cst_29 = arith.constant 2.500000e-01 : f32
    %88 = vector.broadcast %cst_29 : f32 to vector<8x8xf32>
    %89 = arith.mulf %87, %88 : vector<8x8xf32>
    %cst_30 = arith.constant -1.000000e+30 : f32
    %90 = vector.broadcast %cst_30 : f32 to vector<8x8xf32>
    %91 = arith.select %43, %89, %90 : vector<8x8xi1>, vector<8x8xf32>
    %cst_31 = arith.constant dense<0xFF800000> : vector<8xf32>
    %92 = vector.multi_reduction <maximumf>, %91, %cst_31 [1] : vector<8x8xf32> to vector<8xf32>
    %93 = vector.shape_cast %92 : vector<8xf32> to vector<8x1xf32>
    %94 = vector.broadcast %93 : vector<8x1xf32> to vector<8x8xf32>
    %95 = arith.subf %91, %94 : vector<8x8xf32>
    %96 = math.exp %95 : vector<8x8xf32>
    %cst_32 = arith.constant dense<0.000000e+00> : vector<8xf32>
    %97 = vector.multi_reduction <add>, %96, %cst_32 [1] : vector<8x8xf32> to vector<8xf32>
    %98 = vector.shape_cast %97 : vector<8xf32> to vector<8x1xf32>
    %99 = tpu.reciprocal %98 {approx = true} : vector<8x1xf32> -> vector<8x1xf32>
    %100 = vector.broadcast %99 : vector<8x1xf32> to vector<8x8xf32>
    %101 = arith.mulf %96, %100 : vector<8x8xf32>
    %102 = arith.truncf %101 : vector<8x8xf32> to vector<8x8xbf16>
    %cst_33 = arith.constant dense<0.000000e+00> : vector<8x16xf32>
    %103 = tpu.matmul %102, %86, %cst_33 {dimension_numbers = #tpu.dot_dimension_numbers<[1], [0], [0], [1], [0, 0, 1, 1], [], []>} : vector<8x8xbf16>, vector<8x16xbf16>, vector<8x16xf32> -> vector<8x16xf32>
    %104 = vector.extract_strided_slice %37 {offsets = [0, 48], sizes = [8, 16], strides = [1, 1]} : vector<8x64xbf16> to vector<8x16xbf16>
    %105 = vector.extract_strided_slice %39 {offsets = [0, 16], sizes = [8, 16], strides = [1, 1]} : vector<8x32xbf16> to vector<8x16xbf16>
    %106 = vector.extract_strided_slice %40 {offsets = [0, 16], sizes = [8, 16], strides = [1, 1]} : vector<8x32xbf16> to vector<8x16xbf16>
    %cst_34 = arith.constant dense<0.000000e+00> : vector<8x8xf32>
    %107 = tpu.matmul %104, %105, %cst_34 {dimension_numbers = #tpu.dot_dimension_numbers<[1], [1], [0], [0], [0, 0, 1, 0], [], []>} : vector<8x16xbf16>, vector<8x16xbf16>, vector<8x8xf32> -> vector<8x8xf32>
    %cst_35 = arith.constant 2.500000e-01 : f32
    %108 = vector.broadcast %cst_35 : f32 to vector<8x8xf32>
    %109 = arith.mulf %107, %108 : vector<8x8xf32>
    %cst_36 = arith.constant -1.000000e+30 : f32
    %110 = vector.broadcast %cst_36 : f32 to vector<8x8xf32>
    %111 = arith.select %43, %109, %110 : vector<8x8xi1>, vector<8x8xf32>
    %cst_37 = arith.constant dense<0xFF800000> : vector<8xf32>
    %112 = vector.multi_reduction <maximumf>, %111, %cst_37 [1] : vector<8x8xf32> to vector<8xf32>
    %113 = vector.shape_cast %112 : vector<8xf32> to vector<8x1xf32>
    %114 = vector.broadcast %113 : vector<8x1xf32> to vector<8x8xf32>
    %115 = arith.subf %111, %114 : vector<8x8xf32>
    %116 = math.exp %115 : vector<8x8xf32>
    %cst_38 = arith.constant dense<0.000000e+00> : vector<8xf32>
    %117 = vector.multi_reduction <add>, %116, %cst_38 [1] : vector<8x8xf32> to vector<8xf32>
    %118 = vector.shape_cast %117 : vector<8xf32> to vector<8x1xf32>
    %119 = tpu.reciprocal %118 {approx = true} : vector<8x1xf32> -> vector<8x1xf32>
    %120 = vector.broadcast %119 : vector<8x1xf32> to vector<8x8xf32>
    %121 = arith.mulf %116, %120 : vector<8x8xf32>
    %122 = arith.truncf %121 : vector<8x8xf32> to vector<8x8xbf16>
    %cst_39 = arith.constant dense<0.000000e+00> : vector<8x16xf32>
    %123 = tpu.matmul %122, %106, %cst_39 {dimension_numbers = #tpu.dot_dimension_numbers<[1], [0], [0], [1], [0, 0, 1, 1], [], []>} : vector<8x8xbf16>, vector<8x16xbf16>, vector<8x16xf32> -> vector<8x16xf32>
    %124 = tpu.concatenate %63, %83, %103, %123 in 1 : vector<8x16xf32>, vector<8x16xf32>, vector<8x16xf32>, vector<8x16xf32> -> vector<8x64xf32>
    %125 = arith.truncf %124 : vector<8x64xf32> to vector<8x64xbf16>
    %c0_40 = arith.constant 0 : index
    %c0_41 = arith.constant 0 : index
    %126 = vector.load %arg6[%c0_40, %c0_41] : memref<64x32xbf16, #tpu.memory_space<vmem>>, vector<64x32xbf16>
    %cst_42 = arith.constant dense<0.000000e+00> : vector<8x32xf32>
    %127 = tpu.matmul %125, %126, %cst_42 {dimension_numbers = #tpu.dot_dimension_numbers<[1], [0], [0], [1], [0, 0, 1, 1], [], []>} : vector<8x64xbf16>, vector<64x32xbf16>, vector<8x32xf32> -> vector<8x32xf32>
    %128 = arith.addf %127, %1 : vector<8x32xf32>
    %c1 = arith.constant 1 : index
    %c0_43 = arith.constant 0 : index
    %129 = vector.load %arg3[%c1, %c0_43] : memref<2x32xf32, #tpu.memory_space<vmem>>, vector<1x32xf32>
    %130 = arith.mulf %128, %128 : vector<8x32xf32>
    %cst_44 = arith.constant dense<0.000000e+00> : vector<8xf32>
    %131 = vector.multi_reduction <add>, %130, %cst_44 [1] : vector<8x32xf32> to vector<8xf32>
    %132 = vector.shape_cast %131 : vector<8xf32> to vector<8x1xf32>
    %cst_45 = arith.constant 3.200000e+01 : f32
    %133 = vector.broadcast %cst_45 : f32 to vector<8x1xf32>
    %134 = arith.divf %132, %133 : vector<8x1xf32>
    %cst_46 = arith.constant 9.99999997E-7 : f32
    %135 = vector.broadcast %cst_46 : f32 to vector<8x1xf32>
    %136 = arith.addf %134, %135 : vector<8x1xf32>
    %137 = math.rsqrt %136 : vector<8x1xf32>
    %138 = vector.broadcast %137 : vector<8x1xf32> to vector<8x32xf32>
    %139 = arith.mulf %128, %138 : vector<8x32xf32>
    %140 = vector.broadcast %129 : vector<1x32xf32> to vector<8x32xf32>
    %141 = arith.mulf %140, %139 : vector<8x32xf32>
    %142 = arith.truncf %141 : vector<8x32xf32> to vector<8x32xbf16>
    %c0_47 = arith.constant 0 : index
    %c0_48 = arith.constant 0 : index
    %143 = vector.load %arg7[%c0_47, %c0_48] : memref<32x128xbf16, #tpu.memory_space<vmem>>, vector<32x128xbf16>
    %cst_49 = arith.constant dense<0.000000e+00> : vector<8x128xf32>
    %144 = tpu.matmul %142, %143, %cst_49 {dimension_numbers = #tpu.dot_dimension_numbers<[1], [0], [0], [1], [0, 0, 1, 1], [], []>} : vector<8x32xbf16>, vector<32x128xbf16>, vector<8x128xf32> -> vector<8x128xf32>
    %145 = vector.extract_strided_slice %144 {offsets = [0, 0], sizes = [8, 64], strides = [1, 1]} : vector<8x128xf32> to vector<8x64xf32>
    %146 = vector.extract_strided_slice %144 {offsets = [0, 64], sizes = [8, 64], strides = [1, 1]} : vector<8x128xf32> to vector<8x64xf32>
    %147 = arith.negf %145 : vector<8x64xf32>
    %148 = math.exp %147 : vector<8x64xf32>
    %cst_50 = arith.constant 1.000000e+00 : f32
    %149 = vector.broadcast %cst_50 : f32 to vector<8x64xf32>
    %150 = arith.addf %149, %148 : vector<8x64xf32>
    %151 = arith.divf %149, %150 : vector<8x64xf32>
    %152 = arith.mulf %145, %151 : vector<8x64xf32>
    %153 = arith.mulf %152, %146 : vector<8x64xf32>
    %154 = arith.truncf %153 : vector<8x64xf32> to vector<8x64xbf16>
    %c0_51 = arith.constant 0 : index
    %c0_52 = arith.constant 0 : index
    %155 = vector.load %arg8[%c0_51, %c0_52] : memref<64x32xbf16, #tpu.memory_space<vmem>>, vector<64x32xbf16>
    %cst_53 = arith.constant dense<0.000000e+00> : vector<8x32xf32>
    %156 = tpu.matmul %154, %155, %cst_53 {dimension_numbers = #tpu.dot_dimension_numbers<[1], [0], [0], [1], [0, 0, 1, 1], [], []>} : vector<8x64xbf16>, vector<64x32xbf16>, vector<8x32xf32> -> vector<8x32xf32>
    %157 = arith.addf %156, %128 : vector<8x32xf32>
    %c0_54 = arith.constant 0 : index
    %c0_55 = arith.constant 0 : index
    %c0_56 = arith.constant 0 : index
    %158 = vector.load %arg9[%c0_54, %c0_55, %c0_56] : memref<1x8x32xf32, #tpu.memory_space<vmem>>, vector<1x8x32xf32>
    %159 = vector.shape_cast %158 : vector<1x8x32xf32> to vector<8x32xf32>
    %160 = vector.shape_cast %157 : vector<8x32xf32> to vector<1x8x32xf32>
    tpu.vector_store %arg9[%c0_54, %c0_55, %c0_56], %160 {strides = array<i32>} : memref<1x8x32xf32, #tpu.memory_space<vmem>>, vector<1x8x32xf32>,
    return
  }
  func.func @transform_0(%arg0: i32) -> (i32, i32, i32) {
    %c0_i32 = arith.constant 0 : i32
    %c0_i32_0 = arith.constant 0 : i32
    %c0_i32_1 = arith.constant 0 : i32
    return %arg0, %c0_i32, %c0_i32_0 : i32, i32, i32
  }
  func.func @transform_1(%arg0: i32) -> (i32, i32, i32) {
    %c0_i32 = arith.constant 0 : i32
    %c0_i32_0 = arith.constant 0 : i32
    %c0_i32_1 = arith.constant 0 : i32
    return %arg0, %c0_i32, %c0_i32_0 : i32, i32, i32
  }
  func.func @transform_2(%arg0: i32) -> (i32, i32) {
    %c0_i32 = arith.constant 0 : i32
    %c0_i32_0 = arith.constant 0 : i32
    %c0_i32_1 = arith.constant 0 : i32
    return %c0_i32, %c0_i32_0 : i32, i32
  }
  func.func @transform_3(%arg0: i32) -> (i32, i32) {
    %c0_i32 = arith.constant 0 : i32
    %c0_i32_0 = arith.constant 0 : i32
    %c0_i32_1 = arith.constant 0 : i32
    return %c0_i32, %c0_i32_0 : i32, i32
  }
  func.func @transform_4(%arg0: i32) -> (i32, i32) {
    %c0_i32 = arith.constant 0 : i32
    %c0_i32_0 = arith.constant 0 : i32
    %c0_i32_1 = arith.constant 0 : i32
    return %c0_i32, %c0_i32_0 : i32, i32
  }
  func.func @transform_5(%arg0: i32) -> (i32, i32) {
    %c0_i32 = arith.constant 0 : i32
    %c0_i32_0 = arith.constant 0 : i32
    %c0_i32_1 = arith.constant 0 : i32
    return %c0_i32, %c0_i32_0 : i32, i32
  }
  func.func @transform_6(%arg0: i32) -> (i32, i32) {
    %c0_i32 = arith.constant 0 : i32
    %c0_i32_0 = arith.constant 0 : i32
    %c0_i32_1 = arith.constant 0 : i32
    return %c0_i32, %c0_i32_0 : i32, i32
  }
  func.func @transform_7(%arg0: i32) -> (i32, i32) {
    %c0_i32 = arith.constant 0 : i32
    %c0_i32_0 = arith.constant 0 : i32
    %c0_i32_1 = arith.constant 0 : i32
    return %c0_i32, %c0_i32_0 : i32, i32
  }
  func.func @transform_8(%arg0: i32) -> (i32, i32, i32) {
    %c0_i32 = arith.constant 0 : i32
    %c0_i32_0 = arith.constant 0 : i32
    %c0_i32_1 = arith.constant 0 : i32
    return %arg0, %c0_i32, %c0_i32_0 : i32, i32, i32
  }
}

</mosaic_0001>

<bundles_post_ra>
// kernel: tile.29
= control target key start
LH: loop header
LB: loop body
LE: loop exit
PB: predicated region body
PF: predicated region fallthrough
CT: control target
= control target key end

     0   :  { %vm82_vm0 = vcmask 1047556   ;;  %vm84_vm1 = vcmask 130048   ;;  %vm103_vm2 = vcmask 261248   ;;  %s225_s0 = inlined_call_operand.vmem [shape: f32[2,8,2,16], index: 0, kind: input, shape index: {}]   ;;  %s226_s1 = inlined_call_operand.vmem [shape: f32[2,8,32], index: 1, kind: output, shape index: {}]  }
   0x1   :  { %v138_v0 = vld [vmem:[%s225_s0 + $0xe] sm:$0x3]  ;;  %v139_v1 = vld [vmem:[%s225_s0 + $0xc] sm:$0x3]  ;;  %v140_v2 = vld [vmem:[%s225_s0 + $0xa] sm:$0x3] }
   0x2   :  { %48 = vst [vmem:[#allocation0 + $0x38] sm:$0x3] %v138_v0  ;;  %53 = vst [vmem:[#allocation0 + $0x30] sm:$0x3] %v139_v1  ;;  %v141_v3 = vld [vmem:[%s225_s0 + $0x8] sm:$0x3] }
   0x3   :  { %58 = vst [vmem:[#allocation0 + $0x28] sm:$0x3] %v140_v2  ;;  %v142_v4 = vld [vmem:[%s225_s0 + $0x6] sm:$0x3]  ;;  %v143_v5 = vld [vmem:[%s225_s0 + $0x4] sm:$0x3] }
   0x4   :  { %63 = vst [vmem:[#allocation0 + $0x20] sm:$0x3] %v141_v3  ;;  %68 = vst [vmem:[#allocation0 + $0x18] sm:$0x3] %v142_v4  ;;  %v144_v6 = vld [vmem:[%s225_s0 + $0x2] sm:$0x3] }
   0x5   :  { %73 = vst [vmem:[#allocation0 + $0x10] sm:$0x3] %v143_v5  ;;  %v78_v7 = vld [vmem:[%s225_s0] sm:$0x3]  ;;  %77 = vst [vmem:[#allocation0 + $0x8] sm:$0x3] %v144_v6 }
   0x6   :  { %79 = vst [vmem:[#allocation0] sm:$0x3] %v78_v7  ;;  %v130_v8 = vld [vmem:[%s225_s0 + $0x1e] sm:$0x3]  ;;  %v131_v9 = vld [vmem:[%s225_s0 + $0x1c] sm:$0x3] }
   0x7   :  { %v132_v10 = vld [vmem:[%s225_s0 + $0x1a] sm:$0x3]  ;;  %8 = vst [vmem:[#allocation0 + $0x78] sm:$0x3] %v130_v8  ;;  %13 = vst [vmem:[#allocation0 + $0x70] sm:$0x3] %v131_v9 }
   0x8   :  { %18 = vst [vmem:[#allocation0 + $0x68] sm:$0x3] %v132_v10  ;;  %v133_v11 = vld [vmem:[%s225_s0 + $0x18] sm:$0x3]  ;;  %v134_v12 = vld [vmem:[%s225_s0 + $0x16] sm:$0x3] }
   0x9   :  { %v135_v13 = vld [vmem:[%s225_s0 + $0x14] sm:$0x3]  ;;  %23 = vst [vmem:[#allocation0 + $0x60] sm:$0x3] %v133_v11  ;;  %28 = vst [vmem:[#allocation0 + $0x58] sm:$0x3] %v134_v12 }
   0xa   :  { %33 = vst [vmem:[#allocation0 + $0x50] sm:$0x3] %v135_v13  ;;  %v136_v14 = vld [vmem:[%s225_s0 + $0x12] sm:$0x3]  ;;  %v137_v15 = vld [vmem:[%s225_s0 + $0x10] sm:$0x3] }
   0xb   :  { %38 = vst [vmem:[#allocation0 + $0x48] sm:$0x3] %v136_v14  ;;  %43 = vst [vmem:[#allocation0 + $0x40] sm:$0x3] %v137_v15  ;;  %s148_s0 = smov 16  }
   0xc   :  { %v98_v16 = vld [vmem:[#allocation0 + $0x1] ss:$8 sm:$0xf0]   ;;  %v81_v17 = vld [vmem:[#allocation0] ss:$8 sm:$0xf0]  }
   0xd   :  { %v96_v18 = vld [vmem:[#allocation0 + $0x1] ss:$8 sm:$0xf]   ;;  %v80_v19 = vld [vmem:[#allocation0] ss:$8 sm:$0xf]  }
   0xe   :  { %v100_v20 = vsel %vm82_vm0, %v98_v16, %v96_v18  ;;  %v83_v21 = vsel %vm82_vm0, %v81_v17, %v80_v19 }
   0xf   :  { %101 = vrot.lane.b32.xlu0 %v100_v20, %s148_s0  ;;  %85 = vst.msk [vmem:[%s226_s1] sm:$0xff] %vm84_vm1, %v83_v21  }
  0x10   :  { %v108_v22 = vld [vmem:[#allocation0 + $0x41] ss:$8 sm:$0xf0]   ;;  %v89_v23 = vld [vmem:[#allocation0 + $0x40] ss:$8 sm:$0xf0]  }
  0x12   :  { %v106_v24 = vld [vmem:[#allocation0 + $0x41] ss:$8 sm:$0xf]   ;;  %v87_v25 = vld [vmem:[#allocation0 + $0x40] ss:$8 sm:$0xf]  }
  0x13   :  { %v110_v26 = vsel %vm82_vm0, %v108_v22, %v106_v24  ;;  %v91_v27 = vsel %vm82_vm0, %v89_v23, %v87_v25 }
  0x14   :  { %145 = vst.msk [vmem:[%s226_s1 + $0x8] sm:$0xff] %vm84_vm1, %v91_v27   ;;  %111 = vrot.lane.b32.xlu0 %v110_v26, %s148_s0 }
  0x81   :  { %v102_v28 = vpop.permute.xlu0 %101  }
  0x82   :  { %104 = vst.msk [vmem:[%s226_s1] sm:$0xff] %vm103_vm2, %v102_v28  }
  0x86   :  { %v112_v29 = vpop.permute.xlu0 %111  }
  0x87   :  { %146 = vst.msk [vmem:[%s226_s1 + $0x8] sm:$0xff] %vm103_vm2, %v112_v29  }

// kernel: tile.24
= control target key start
LH: loop header
LB: loop body
LE: loop exit
PB: predicated region body
PF: predicated region fallthrough
CT: control target
= control target key end

     0   :  { %vm82_vm0 = vcmask 1047556   ;;  %vm84_vm1 = vcmask 130048   ;;  %s195_s9 = smov 48   ;;  %s196_s14 = smov 16   ;;  %vm103_vm2 = vcmask 523648   ;;  %vm124_vm3 = vcmask 392448   ;;  %s289_s0 = inlined_call_operand.vmem [shape: f32[2,8,4,16], index: 0, kind: input, shape index: {}]   ;;  %s290_s1 = inlined_call_operand.vmem [shape: f32[2,8,64], index: 1, kind: output, shape index: {}]  }
   0x1   :  { %v180_v0 = vld [vmem:[%s289_s0 + $0x1c] sm:$0xf]  ;;  %v181_v1 = vld [vmem:[%s289_s0 + $0x18] sm:$0xf]  ;;  %v182_v2 = vld [vmem:[%s289_s0 + $0x14] sm:$0xf] }
   0x2   :  { %48 = vst [vmem:[#allocation0 + $0x38] sm:$0xf] %v180_v0  ;;  %53 = vst [vmem:[#allocation0 + $0x30] sm:$0xf] %v181_v1  ;;  %v183_v3 = vld [vmem:[%s289_s0 + $0x10] sm:$0xf] }
   0x3   :  { %58 = vst [vmem:[#allocation0 + $0x28] sm:$0xf] %v182_v2  ;;  %v184_v4 = vld [vmem:[%s289_s0 + $0xc] sm:$0xf]  ;;  %v185_v5 = vld [vmem:[%s289_s0 + $0x8] sm:$0xf] }
   0x4   :  { %63 = vst [vmem:[#allocation0 + $0x20] sm:$0xf] %v183_v3  ;;  %68 = vst [vmem:[#allocation0 + $0x18] sm:$0xf] %v184_v4  ;;  %v186_v6 = vld [vmem:[%s289_s0 + $0x4] sm:$0xf] }
   0x5   :  { %73 = vst [vmem:[#allocation0 + $0x10] sm:$0xf] %v185_v5  ;;  %v78_v7 = vld [vmem:[%s289_s0] sm:$0xf]  ;;  %77 = vst [vmem:[#allocation0 + $0x8] sm:$0xf] %v186_v6 }
   0x6   :  { %79 = vst [vmem:[#allocation0] sm:$0xf] %v78_v7  ;;  %v172_v8 = vld [vmem:[%s289_s0 + $0x3c] sm:$0xf]  ;;  %v173_v9 = vld [vmem:[%s289_s0 + $0x38] sm:$0xf] }
   0x7   :  { %8 = vst [vmem:[#allocation0 + $0x78] sm:$0xf] %v172_v8  ;;  %13 = vst [vmem:[#allocation0 + $0x70] sm:$0xf] %v173_v9  ;;  %v174_v10 = vld [vmem:[%s289_s0 + $0x34] sm:$0xf] }
   0x8   :  { %v175_v11 = vld [vmem:[%s289_s0 + $0x30] sm:$0xf]  ;;  %v176_v12 = vld [vmem:[%s289_s0 + $0x2c] sm:$0xf]  ;;  %18 = vst [vmem:[#allocation0 + $0x68] sm:$0xf] %v174_v10 }
   0x9   :  { %23 = vst [vmem:[#allocation0 + $0x60] sm:$0xf] %v175_v11  ;;  %28 = vst [vmem:[#allocation0 + $0x58] sm:$0xf] %v176_v12  ;;  %v177_v13 = vld [vmem:[%s289_s0 + $0x28] sm:$0xf] }
   0xa   :  { %v178_v14 = vld [vmem:[%s289_s0 + $0x24] sm:$0xf]  ;;  %v179_v15 = vld [vmem:[%s289_s0 + $0x20] sm:$0xf]  ;;  %33 = vst [vmem:[#allocation0 + $0x50] sm:$0xf] %v177_v13 }
   0xb   :  { %38 = vst [vmem:[#allocation0 + $0x48] sm:$0xf] %v178_v14  ;;  %43 = vst [vmem:[#allocation0 + $0x40] sm:$0xf] %v179_v15  ;;  %s194_s0 = smov 32   ;;  %vm145_vm4 = vcmask 261248  }
   0xc   :  { %v119_v16 = vld [vmem:[#allocation0 + $0x2] ss:$8 sm:$0xf0]   ;;  %v98_v17 = vld [vmem:[#allocation0 + $0x3] ss:$8 sm:$0xf0]  }
   0xd   :  { %v117_v18 = vld [vmem:[#allocation0 + $0x2] ss:$8 sm:$0xf]   ;;  %v96_v19 = vld [vmem:[#allocation0 + $0x3] ss:$8 sm:$0xf]  }
   0xe   :  { %v121_v20 = vsel %vm82_vm0, %v119_v16, %v117_v18  ;;  %v100_v21 = vsel %vm82_vm0, %v98_v17, %v96_v19  ;;  %v138_v24 = vld [vmem:[#allocation0 + $0x1] ss:$8 sm:$0xf]   ;;  %v80_v32 = vld [vmem:[#allocation0] ss:$8 sm:$0xf]  }
   0xf   :  { %122 = vrot.lane.b32.xlu1 %v121_v20, %s194_s0  ;;  %101 = vrot.lane.b32.xlu0 %v100_v21, %s195_s9  ;;  %v140_v25 = vld [vmem:[#allocation0 + $0x1] ss:$8 sm:$0xf0]   ;;  %v81_v33 = vld [vmem:[#allocation0] ss:$8 sm:$0xf0]  }
  0x10   :  { %v129_v22 = vld [vmem:[#allocation0 + $0x42] ss:$8 sm:$0xf0]   ;;  %v108_v23 = vld [vmem:[#allocation0 + $0x43] ss:$8 sm:$0xf0]   ;;  %v83_v34 = vsel %vm82_vm0, %v81_v33, %v80_v32  ;;  %v142_v38 = vsel %vm82_vm0, %v140_v25, %v138_v24 }
  0x11   :  { %v150_v31 = vld [vmem:[#allocation0 + $0x41] ss:$8 sm:$0xf0]   ;;  %v89_v36 = vld [vmem:[#allocation0 + $0x40] ss:$8 sm:$0xf0]  }
  0x12   :  { %v127_v26 = vld [vmem:[#allocation0 + $0x42] ss:$8 sm:$0xf]   ;;  %v106_v27 = vld [vmem:[#allocation0 + $0x43] ss:$8 sm:$0xf]  }
  0x13   :  { %v131_v28 = vsel %vm82_vm0, %v129_v22, %v127_v26  ;;  %v110_v29 = vsel %vm82_vm0, %v108_v23, %v106_v27  ;;  %v148_v30 = vld [vmem:[#allocation0 + $0x41] ss:$8 sm:$0xf]   ;;  %v87_v35 = vld [vmem:[#allocation0 + $0x40] ss:$8 sm:$0xf]  }
  0x14   :  { %132 = vrot.lane.b32.xlu1 %v131_v28, %s194_s0  ;;  %111 = vrot.lane.b32.xlu0 %v110_v29, %s195_s9  ;;  %v152_v37 = vsel %vm82_vm0, %v150_v31, %v148_v30  ;;  %85 = vst.msk [vmem:[%s290_s1] sm:$0xff] %vm84_vm1, %v83_v34   ;;  %v91_v39 = vsel %vm82_vm0, %v89_v36, %v87_v35 }
  0x15   :  { %187 = vst.msk [vmem:[%s290_s1 + $0x8] sm:$0xff] %vm84_vm1, %v91_v39  }
  0x18   :  { %153 = vrot.lane.b32.xlu1 %v152_v37, %s196_s14  ;;  %143 = vrot.lane.b32.xlu0 %v142_v38, %s196_s14 }
  0x81   :  { %v123_v40 = vpop.permute.xlu1 %122   ;;  %v102_v41 = vpop.permute.xlu0 %101  }
  0x82   :  { %104 = vst.msk [vmem:[%s290_s1] sm:$0xff] %vm103_vm2, %v102_v41  }
  0x83   :  { %125 = vst.msk [vmem:[%s290_s1] sm:$0xff] %vm124_vm3, %v123_v40  }
  0x86   :  { %v133_v42 = vpop.permute.xlu1 %132   ;;  %v112_v43 = vpop.permute.xlu0 %111  }
  0x87   :  { %188 = vst.msk [vmem:[%s290_s1 + $0x8] sm:$0xff] %vm103_vm2, %v112_v43  }
  0x88   :  { %189 = vst.msk [vmem:[%s290_s1 + $0x8] sm:$0xff] %vm124_vm3, %v133_v42  }
  0x8a   :  { %v154_v44 = vpop.permute.xlu1 %153   ;;  %v144_v45 = vpop.permute.xlu0 %143  }
  0x8b   :  { %190 = vst.msk [vmem:[%s290_s1 + $0x8] sm:$0xff] %vm145_vm4, %v154_v44   ;;  %146 = vst.msk [vmem:[%s290_s1] sm:$0xff] %vm145_vm4, %v144_v45  }

// kernel: decoder_layer.1
= control target key start
LH: loop header
LB: loop body
LE: loop exit
PB: predicated region body
PF: predicated region fallthrough
CT: control target
= control target key end

     0   :  { %s2745_s0 = inlined_call_operand.hbm [shape: f32[2,8,32], index: 0, kind: input, shape index: {}]   ;;  %s2746_s1 = inlined_call_operand.hbm [shape: f32[2,8,192], index: 1, kind: input, shape index: {}]   ;;  %s2747_s2 = inlined_call_operand.hbm [shape: f32[2,32], index: 2, kind: input, shape index: {}]   ;;  %s2748_s3 = inlined_call_operand.hbm [shape: bf16[32,224], index: 3, kind: input, shape index: {}]   ;;  %s2749_s4 = inlined_call_operand.hbm [shape: bf16[96,96], index: 4, kind: input, shape index: {}]   ;;  %s2750_s5 = inlined_call_operand.hbm [shape: bf16[64,32], index: 5, kind: input, shape index: {}]   ;;  %s2751_s6 = inlined_call_operand.hbm [shape: bf16[32,128], index: 6, kind: input, shape index: {}]   ;;  %s2752_s7 = inlined_call_operand.hbm [shape: bf16[64,32], index: 7, kind: input, shape index: {}]   ;;  %s2753_s8 = inlined_call_operand.hbm [shape: f32[2,8,32], index: 8, kind: output, shape index: {}]  }
   0x1   :  { %2758 = sst [smem:[#allocation24_spill]] %s2745_s0 }
   0x2   :  { %2759 = sst [smem:[#allocation25_spill]] %s2747_s2 }
   0x3   :  { %2760 = sst [smem:[#allocation26_spill]] %s2748_s3 }
   0x4   :  { %2761 = sst [smem:[#allocation27_spill]] %s2749_s4 }
   0x5   :  { %13 = vsyncpa [#allocation3], 0 }
   0x6   :  { %15 = vsyncpa [#allocation3 + $0x1], 0 }
   0x7   :  { %16 = vsyncpa [#allocation6], 0 }
   0x8   :  { %18 = vsyncpa [#allocation6 + $0x1], 0 }
   0x9   :  { %19 = vsyncpa [#allocation9], 0 }
   0xa   :  { %20 = vsyncpa [#allocation12], 0 }
   0xb   :  { %21 = vsyncpa [#allocation15], 0 }
   0xc   :  { %22 = vsyncpa [#allocation4], 0 }
   0xd   :  { %24 = vsyncpa [#allocation4 + $0x1], 0  ;;  %s2253_s27 = smov 0   ;;  %s2255_s28 = smov 0  }
   0xe   :  { %s2257_s29 = smov 0   ;;  %s2259_s30 = smov 0  }
   0xf LB: > { %s2185_s9 = smov [#allocation7]   ;;  %s2274_s11 = sadd.s32 4294967295, %s2183_s30   ;;  %s2183_s30 = sphi %s2259_s30, %s2792_s30   ;;  %s2179_s29 = sphi %s2257_s29, %s2791_s29   ;;  %s2175_s28 = sphi %s2255_s28, %s2790_s28   ;;  %s2171_s27 = sphi %s2253_s27, %s2789_s27  }
  0x10   : > { %s252_s10 = sshll.u32 %s2185_s9, 4  ;;  %p1499_p0 = scmp.ge.s32.totalorder %s2183_s30, 1  ;;  %s253_s10 = int_to_ptr.vmem [resolvable:$true] %s252_s10 }
  0x11   : > { %p2754_p1 = scmp.eq.s32.totalorder %s2274_s11, 0  ;;  %p239_p2 = scmp.lt.s32.totalorder %s2183_s30, 3 }
  0x12   : > { %s2186_s13 = smov [#allocation8]   ;;  %s2187_s16 = smov [#allocation11]  }
  0x13   : > { %p2279_p3 = pnand %p1499_p0, %p239_p2  ;;  %s262_s14 = sshll.u32 %s2186_s13, 4  ;;  %s2286_s14 = int_to_ptr.vmem [resolvable:$true] %s262_s14 }
  0x14   : > { %s2294_s17 = sshll.u32 %s2187_s16, 4  ;;  %s2764_s2 = sld [smem:[#allocation25_spill]]  ;;  %s289_s17 = int_to_ptr.vmem [resolvable:$true] %s2294_s17 }
  0x15   : > { %s2762_s12 = scalar_select %p2279_p3, 1, 0 }
  0x16   : > { %p1725_p5 = pneg %p2279_p3 }
  0x18   : > { %p2290_p6 = pnand %p1725_p5, %p2754_p1 }
  0x1a   : > { %s1869_s20 = scalar_lea.hbm %s2764_s2, 32  ;;  %p2304_p8 = pneg %p2290_p6 }
  0x1b   : > { %p1870_p7 = scmp.ne.s32.totalorder %s2764_s2, %s1869_s20  ;;  %p1876_p11 = scmp.lt.u32.totalorder %s1869_s20, %s2764_s2 }
  0x1d   : > { %p1872_p9 = pnand %p2304_p8, %p1870_p7 }
  0x1f   : > { %p1873_p10 = pneg %p1872_p9 }
  0x21   : > { %p1878_p12 = pnand %p1876_p11, %p1873_p10 }
  0x23   : > { %1881 = shalt.err (!%p1878_p12)
}
  0x24   : > { %s1882_s26 = scalar_lea.vmem %s253_s10, 32  ;;  %p1890_p5 = scmp.lt.s32.totalorder %s253_s10, %s253_s10 }
  0x25   : > { %p1883_p13 = scmp.ne.s32.totalorder %s253_s10, %s1882_s26  ;;  %p1891_p4 = scmp.lt.s32.totalorder %s1882_s26, %s1882_s26 }
  0x27   : > { %p1885_p0 = pnand %p1883_p13, %p2304_p8  ;;  %p1892_p1 = por %p1891_p4, %p1890_p5 }
  0x29   : > { %p1886_p2 = pneg %p1885_p0 }
  0x2b   : > { %p1893_p3 = pnand %p1892_p1, %p1886_p2 }
  0x2d   : > { %1896 = shalt.err (!%p1893_p3)
}
  0x2e   : > { %1728 = dma.hbm_to_vmem [thread:$0]  (!%p2290_p6), %s2764_s2, 32, %s253_s10, [#allocation6]  }
  0x2f   : > { %s2766_s3 = sld [smem:[#allocation26_spill]] }
  0x35   : > { %s1897_s19 = scalar_lea.hbm %s2766_s3, 512 }
  0x36   : > { %p1898_p7 = scmp.ne.s32.totalorder %s2766_s3, %s1897_s19  ;;  %p1904_p1 = scmp.lt.u32.totalorder %s1897_s19, %s2766_s3 }
  0x38   : > { %p1900_p9 = pnand %p1898_p7, %p2304_p8 }
  0x3a   : > { %p1901_p4 = pneg %p1900_p9 }
  0x3c   : > { %p1906_p3 = pnand %p1904_p1, %p1901_p4 }
  0x3e   : > { %1909 = shalt.err (!%p1906_p3)
}
  0x3f   : > { %s1910_s10 = scalar_lea.vmem %s2286_s14, 512  ;;  %p1918_p13 = scmp.lt.s32.totalorder %s2286_s14, %s2286_s14 }
  0x40   : > { %p1911_p10 = scmp.ne.s32.totalorder %s2286_s14, %s1910_s10  ;;  %p1919_p0 = scmp.lt.s32.totalorder %s1910_s10, %s1910_s10 }
  0x42   : > { %p1913_p11 = pnand %p1911_p10, %p2304_p8  ;;  %p1920_p2 = por %p1919_p0, %p1918_p13 }
  0x44   : > { %p1914_p12 = pneg %p1913_p11 }
  0x46   : > { %p1921_p5 = pnand %p1920_p2, %p1914_p12 }
  0x48   : > { %1924 = shalt.err (!%p1921_p5)
}
  0x49   : > { %s2188_s25 = smov 128   ;;  %s2189_s26 = smov 8  }
  0x4a   : > { %1731 = dma.hbm_to_vmem [thread:$0]  (!%p2290_p6), %s2766_s3, 512, %s2286_s14, [#allocation9], %s2188_s25, %s2188_s25, %s2189_s26  }
  0x4b   : > { %s1925_s19 = scalar_lea.hbm %s2750_s5, 512 }
  0x4c   : > { %p1926_p7 = scmp.ne.s32.totalorder %s2750_s5, %s1925_s19  ;;  %p1932_p1 = scmp.lt.u32.totalorder %s1925_s19, %s2750_s5 }
  0x4e   : > { %p1928_p9 = pnand %p1926_p7, %p2304_p8 }
  0x50   : > { %p1929_p4 = pneg %p1928_p9 }
  0x52   : > { %p1934_p3 = pnand %p1932_p1, %p1929_p4 }
  0x54   : > { %1937 = shalt.err (!%p1934_p3)
}
  0x55   : > { %s1938_s10 = scalar_lea.vmem %s289_s17, 512  ;;  %p1946_p13 = scmp.lt.s32.totalorder %s289_s17, %s289_s17 }
  0x56   : > { %p1939_p10 = scmp.ne.s32.totalorder %s289_s17, %s1938_s10  ;;  %p1947_p0 = scmp.lt.s32.totalorder %s1938_s10, %s1938_s10 }
  0x58   : > { %p1941_p11 = pnand %p1939_p10, %p2304_p8  ;;  %p1948_p2 = por %p1947_p0, %p1946_p13 }
  0x5a   : > { %p1942_p12 = pneg %p1941_p11 }
  0x5c   : > { %p1949_p5 = pnand %p1948_p2, %p1942_p12 }
  0x5e   : > { %1952 = shalt.err (!%p1949_p5)
}
  0x5f   : > { %s2190_s14 = smov 64   ;;  %s2191_s25 = smov 4  }
  0x60   : > { %1737 = dma.hbm_to_vmem [thread:$0]  (!%p2290_p6), %s2750_s5, 512, %s289_s17, [#allocation12], %s2190_s14, %s2190_s14, %s2191_s25  }
  0x61   : > { %s2192_s13 = smov [#allocation10]   ;;  %s2193_s18 = smov [#allocation13]  }
  0x62   : > { %s275_s16 = sshll.u32 %s2192_s13, 4  ;;  %s301_s19 = sshll.u32 %s2193_s18, 4  ;;  %s276_s16 = int_to_ptr.vmem [resolvable:$true] %s275_s16  ;;  %s302_s19 = int_to_ptr.vmem [resolvable:$true] %s301_s19 }
  0x63   : > { %s2767_s4 = sld [smem:[#allocation27_spill]] }
  0x69   : > { %s1953_s22 = scalar_lea.hbm %s2767_s4, 768 }
  0x6a   : > { %p1954_p7 = scmp.ne.s32.totalorder %s2767_s4, %s1953_s22  ;;  %p1960_p1 = scmp.lt.u32.totalorder %s1953_s22, %s2767_s4 }
  0x6c   : > { %p1956_p9 = pnand %p1954_p7, %p2304_p8 }
  0x6e   : > { %p1957_p4 = pneg %p1956_p9 }
  0x70   : > { %p1962_p3 = pnand %p1960_p1, %p1957_p4 }
  0x72   : > { %1965 = shalt.err (!%p1962_p3)
}
  0x73   : > { %s1966_s17 = scalar_lea.vmem %s276_s16, 768  ;;  %p1974_p13 = scmp.lt.s32.totalorder %s276_s16, %s276_s16 }
  0x74   : > { %p1967_p10 = scmp.ne.s32.totalorder %s276_s16, %s1966_s17  ;;  %p1975_p0 = scmp.lt.s32.totalorder %s1966_s17, %s1966_s17 }
  0x76   : > { %p1969_p11 = pnand %p1967_p10, %p2304_p8  ;;  %p1976_p2 = por %p1975_p0, %p1974_p13 }
  0x78   : > { %p1970_p12 = pneg %p1969_p11 }
  0x7a   : > { %p1977_p5 = pnand %p1976_p2, %p1970_p12 }
  0x7c   : > { %1980 = shalt.err (!%p1977_p5)
}
  0x7d   : > { %1734 = dma.hbm_to_vmem [thread:$0]  (!%p2290_p6), %s2767_s4, 768, %s276_s16, [#allocation9], %s2190_s14, %s2190_s14, %s2191_s25  }
  0x7e   : > { %s1981_s13 = scalar_lea.hbm %s2751_s6, 256 }
  0x7f   : > { %p1982_p7 = scmp.ne.s32.totalorder %s2751_s6, %s1981_s13  ;;  %p1988_p1 = scmp.lt.u32.totalorder %s1981_s13, %s2751_s6 }
  0x81   : > { %p1984_p9 = pnand %p1982_p7, %p2304_p8 }
  0x83   : > { %p1985_p4 = pneg %p1984_p9 }
  0x85   : > { %p1990_p3 = pnand %p1988_p1, %p1985_p4 }
  0x87   : > { %1993 = shalt.err (!%p1990_p3)
}
  0x88   : > { %s1994_s24 = scalar_lea.vmem %s302_s19, 256  ;;  %p2002_p13 = scmp.lt.s32.totalorder %s302_s19, %s302_s19 }
  0x89   : > { %p1995_p10 = scmp.ne.s32.totalorder %s302_s19, %s1994_s24  ;;  %p2003_p0 = scmp.lt.s32.totalorder %s1994_s24, %s1994_s24 }
  0x8b   : > { %p1997_p11 = pnand %p1995_p10, %p2304_p8  ;;  %p2004_p2 = por %p2003_p0, %p2002_p13 }
  0x8d   : > { %p1998_p12 = pneg %p1997_p11 }
  0x8f   : > { %p2005_p5 = pnand %p2004_p2, %p1998_p12 }
  0x91   : > { %2008 = shalt.err (!%p2005_p5)
}
  0x92   : > { %1740 = dma.hbm_to_vmem [thread:$0]  (!%p2290_p6), %s2751_s6, 256, %s302_s19, [#allocation12], %s2190_s14, %s2190_s14, %s2191_s25  }
  0x93   : > { %s2194_s17 = smov [#allocation14]   ;;  %s2009_s9 = scalar_lea.hbm %s2752_s7, 512 }
  0x94   : > { %s314_s2 = sshll.u32 %s2194_s17, 4  ;;  %p2010_p7 = scmp.ne.s32.totalorder %s2752_s7, %s2009_s9  ;;  %s315_s2 = int_to_ptr.vmem [resolvable:$true] %s314_s2 }
  0x95   : > { %p2016_p1 = scmp.lt.u32.totalorder %s2009_s9, %s2752_s7 }
  0x96   : > { %p2012_p9 = pnand %p2010_p7, %p2304_p8 }
  0x98   : > { %p2013_p4 = pneg %p2012_p9 }
  0x9a   : > { %p2018_p3 = pnand %p2016_p1, %p2013_p4 }
  0x9c   : > { %2021 = shalt.err (!%p2018_p3)
}
  0x9d   : > { %s2022_s19 = scalar_lea.vmem %s315_s2, 512  ;;  %p2030_p13 = scmp.lt.s32.totalorder %s315_s2, %s315_s2 }
  0x9e   : > { %p2023_p10 = scmp.ne.s32.totalorder %s315_s2, %s2022_s19  ;;  %p2031_p0 = scmp.lt.s32.totalorder %s2022_s19, %s2022_s19 }
  0xa0   : > { %p2025_p11 = pnand %p2023_p10, %p2304_p8  ;;  %p2032_p2 = por %p2031_p0, %p2030_p13 }
  0xa2   : > { %p2026_p12 = pneg %p2025_p11 }
  0xa4   : > { %p2033_p5 = pnand %p2032_p2, %p2026_p12 }
  0xa6   : > { %2036 = shalt.err (!%p2033_p5)
}
  0xa7   : > { %1743 = dma.hbm_to_vmem [thread:$0]  (!%p2290_p6), %s2752_s7, 512, %s315_s2, [#allocation15], %s2190_s14, %s2190_s14, %s2191_s25  }
  0xa8   : > { %s1498_s15 = sadd.s32 4294967294, %s2183_s30   ;;  %s2430_s23 = sadd.s32 1, %s2183_s30  }
  0xa9   : > { %s34_s16 = ssub.s32 %s2183_s30, %s2430_s23  ;;  %s37_s10 = sadd.s32 1, %s2179_s29 }
  0xaa   : > { %p35_p8 = scmp.eq.s32.totalorder %s34_s16, 0  ;;  %p44_p7 = scmp.ne.s32.totalorder %s2179_s29, %s2175_s28 }
  0xab   : > { %p45_p9 = scmp.eq.s32.totalorder %s2183_s30, 0  ;;  %p50_p4 = scmp.ne.s32.totalorder %s2175_s28, %s2171_s27 }
  0xac   : > { %s2441_s17 = scalar_select %p35_p8, %s2179_s29, %s37_s10  }
  0xad   : > { %p2443_p1 = por %p45_p9, %p44_p7  ;;  %p2769_p3 = scmp.eq.s32.totalorder %s2274_s11, 0 }
  0xae   : > { %p226_p10 = scmp.eq.s32.totalorder %s2274_s11, 1  ;;  %p232_p11 = scmp.eq.s32.totalorder %s1498_s15, 1 }
  0xaf   : > { %p2449_p6 = por %p2769_p3, %p50_p4  ;;  %p1761_p12 = scmp.lt.s32.totalorder %s2183_s30, 2 }
  0xb0   : > { %s2456_s25 = sand.u32 1, %s2179_s29   ;;  %p2458_p13 = por %p226_p10, %p44_p7 }
  0xb1   : > { %s2770_s14 = scalar_select %p2449_p6, 1, 0 }
  0xb2   : > { %s2771_s2 = scalar_select %p2458_p13, 1, 0 }
  0xb3   : > { %p2462_p0 = por %p232_p11, %p50_p4  ;;  %s1507_s9 = sshll.u32 %s2456_s25, 3 }
  0xb4   : > { %s1508_s13 = sshll.u32 %s2183_s30, 7  ;;  %s2773_s0 = sld [smem:[#allocation24_spill]] }
  0xb5   : > { %s2772_s26 = scalar_select %p2462_p0, 1, 0 }
  0xb6   : > { %s332_s19 = scalar_lea.vmem [#allocation2], %s1507_s9  ;;  %p2477_p2 = pnand %p1761_p12, %p2443_p1 }
  0xb7   : > { %s339_s22 = sshll.u32 %s332_s19, 4  ;;  %s1509_s16 = sshll.u32 %s2456_s25, 4  ;;  %s2473_s22 = int_to_ptr.vmem [resolvable:$true] %s339_s22 }
  0xb8   : > { %s329_s10 = scalar_lea.sflag [#allocation3], %s2456_s25  ;;  %p2039_p8 = pneg %p2477_p2 }
  0xba   : > { %s2471_s21 = scalar_lea.hbm %s2773_s0, %s1508_s13  ;;  %s2042_s3 = scalar_lea.hbm %s2773_s0, 256 }
  0xbb   : > { %s2037_s13 = scalar_lea.hbm %s2471_s21, 128  ;;  %p2043_p4 = scmp.lt.u32.totalorder %s2471_s21, %s2773_s0 }
  0xbc   : > { %p2038_p5 = scmp.ne.s32.totalorder %s2471_s21, %s2037_s13  ;;  %p2044_p1 = scmp.lt.u32.totalorder %s2042_s3, %s2037_s13 }
  0xbd   : > { %p2046_p10 = scmp.lt.u32.totalorder %s2037_s13, %s2471_s21 }
  0xbe   : > { %p2040_p7 = pnand %p2039_p8, %p2038_p5  ;;  %p2045_p3 = por %p2044_p1, %p2043_p4 }
  0xc0   : > { %p2041_p9 = pneg %p2040_p7  ;;  %p2047_p11 = por %p2046_p10, %p2045_p3 }
  0xc2   : > { %p2048_p12 = pnand %p2047_p11, %p2041_p9 }
  0xc4   : > { %2051 = shalt.err (!%p2048_p12)
}
  0xc5   : > { %s2052_s15 = scalar_lea.vmem %s2473_s22, 128  ;;  %s2195_s9 = smov [#allocation2]  }
  0xc6   : > { %p2053_p5 = scmp.ne.s32.totalorder %s2473_s22, %s2052_s15  ;;  %s2057_s18 = sshll.u32 %s2195_s9, 4  ;;  %s2058_s18 = int_to_ptr.vmem [resolvable:$false] %s2057_s18 }
  0xc7   : > { %s2059_s20 = scalar_lea.vmem %s2058_s18, 256  ;;  %p2060_p13 = scmp.lt.s32.totalorder %s2473_s22, %s2058_s18 }
  0xc8   : > { %p2055_p7 = pnand %p2053_p5, %p2039_p8  ;;  %p2061_p4 = scmp.lt.s32.totalorder %s2059_s20, %s2052_s15 }
  0xca   : > { %p2056_p0 = pneg %p2055_p7  ;;  %p2062_p1 = por %p2061_p4, %p2060_p13 }
  0xcc   : > { %p2063_p3 = pnand %p2062_p1, %p2056_p0 }
  0xce   : > { %2066 = shalt.err (!%p2063_p3)
}
  0xcf   : > { %1747 = dma.hbm_to_vmem [thread:$0]  (!%p2477_p2), %s2471_s21, 128, %s2473_s22, %s329_s10  }
  0xd0   : > { %s1562_s13 = sshll.u32 %s2183_s30, 8  ;;  %s350_s15 = scalar_lea.vmem [#allocation5], %s1509_s16 }
  0xd1   : > { %s2513_s9 = scalar_lea.hbm %s2746_s1, %s1562_s13  ;;  %s358_s18 = sshll.u32 %s350_s15, 4  ;;  %s359_s18 = int_to_ptr.vmem [resolvable:$true] %s358_s18 }
  0xd2   : > { %s2775_s20 = sand.u32 1, %s2183_s30   ;;  %s2067_s4 = scalar_lea.hbm %s2513_s9, 256 }
  0xd3   : > { %s347_s0 = scalar_lea.sflag [#allocation6], %s2775_s20  ;;  %p2068_p13 = scmp.ne.s32.totalorder %s2513_s9, %s2067_s4 }
  0xd4   : > { %s2072_s10 = scalar_lea.hbm %s2746_s1, 512  ;;  %p2073_p10 = scmp.lt.u32.totalorder %s2513_s9, %s2746_s1 }
  0xd5   : > { %p2070_p0 = pnand %p2068_p13, %p2039_p8  ;;  %p2074_p11 = scmp.lt.u32.totalorder %s2072_s10, %s2067_s4 }
  0xd6   : > { %p2076_p5 = scmp.lt.u32.totalorder %s2067_s4, %s2513_s9 }
  0xd7   : > { %p2071_p9 = pneg %p2070_p0  ;;  %p2075_p12 = por %p2074_p11, %p2073_p10 }
  0xd9   : > { %p2077_p7 = por %p2076_p5, %p2075_p12 }
  0xdb   : > { %p2078_p4 = pnand %p2077_p7, %p2071_p9 }
  0xdd   : > { %2081 = shalt.err (!%p2078_p4)
}
  0xde   : > { %s2082_s16 = scalar_lea.vmem %s359_s18, 256  ;;  %s2196_s3 = smov [#allocation5]  }
  0xdf   : > { %p2083_p1 = scmp.ne.s32.totalorder %s359_s18, %s2082_s16  ;;  %s2087_s19 = sshll.u32 %s2196_s3, 4  ;;  %s2088_s19 = int_to_ptr.vmem [resolvable:$false] %s2087_s19 }
  0xe0   : > { %s2089_s15 = scalar_lea.vmem %s2088_s19, 512  ;;  %p2090_p0 = scmp.lt.s32.totalorder %s359_s18, %s2088_s19 }
  0xe1   : > { %p2085_p3 = pnand %p2083_p1, %p2039_p8  ;;  %p2091_p6 = scmp.lt.s32.totalorder %s2089_s15, %s2082_s16 }
  0xe3   : > { %p2086_p13 = pneg %p2085_p3  ;;  %p2092_p10 = por %p2091_p6, %p2090_p0 }
  0xe5   : > { %p2093_p11 = pnand %p2092_p10, %p2086_p13 }
  0xe7   : > { %2096 = shalt.err (!%p2093_p11)
}
  0xe8   : > { %1750 = dma.hbm_to_vmem [thread:$0]  (!%p2477_p2), %s2513_s9, 256, %s359_s18, %s347_s0  }
  0xe9   : > { %p2776_p9 = scmp.ne.s32.totalorder %s2762_s12, 0 }
  0xea   : > { %s2541_s4 = sand.u32 (!%p2776_p9), 1, %s2175_s28   ;;  %p2777_p6 = scmp.ne.s32.totalorder (!%p2776_p9), %s2770_s14, 0 }
  0xeb   : > { %367 = sbr.rel (%p2776_p9) target bundleno = 3348 (0xd14), region = 52  ;;  %s1513_s20 = sshll.u32 (!%p2776_p9), %s2541_s4, 3 }
  0xec   : > { %s370_s21 = scalar_lea.sflag (!%p2776_p9), [#allocation3], %s2541_s4  ;;  %s373_s22 = scalar_lea.vmem (!%p2776_p9), [#allocation2], %s1513_s20 }
  0xf2   : > { %2142 = dma.done.wait (%p2777_p6), %s370_s21, 128  }
  0xf3   : > { %2144 = vsyncadd (%p2777_p6), %s370_s21, 4294967168  ;;  %s378_s0 = sand.u32 1, %s2274_s11   ;;  %s1514_s12 = sshll.u32 %s2541_s4, 4 }
  0xf4   : > { %s379_s24 = scalar_lea.sflag [#allocation6], %s378_s0  ;;  %s2553_s9 = scalar_lea.vmem [#allocation5], %s1514_s12 }
  0xf5   : > { %2146 = dma.done.wait (%p2777_p6), %s379_s24, 256  }
  0xf6   : > { %2148 = vsyncadd (%p2777_p6), %s379_s24, 4294967040  ;;  %p2778_p2 = scmp.eq.s32.totalorder %s2274_s11, 0 }
  0xf8   : > { %2150 = dma.done.wait (%p2778_p2), [#allocation6], 32   ;;  %p2779_p8 = pmov %p2778_p2 }
  0xf9   : > { %p2780_p12 = pmov %p2778_p2 }
  0xfa   : > { %2152 = vsyncadd (%p2779_p8), [#allocation6], 4294967264 }
  0xfb   : > { %2154 = dma.done.wait (%p2780_p12), [#allocation9], 1280   ;;  %p2781_p5 = pmov %p2778_p2 }
  0xfc   : > { %p2782_p7 = pmov %p2778_p2 }
  0xfd   : > { %2156 = vsyncadd (%p2781_p5), [#allocation9], 4294966016 }
  0xfe   : > { %2158 = dma.done.wait (%p2782_p7), [#allocation12], 768   ;;  %p2783_p4 = pmov %p2778_p2 }
  0xff   : > { %p2784_p1 = pmov %p2778_p2 }
 0x100   : > { %2160 = vsyncadd (%p2783_p4), [#allocation12], 4294966528 }
 0x101   : > { %2162 = dma.done.wait (%p2784_p1), [#allocation15], 512   ;;  %p2785_p3 = pmov %p2784_p1 }
 0x102   : > { %v2575_v0 = vld [vmem:[%s373_s22] sm:$0xff]  ;;  %vm448_vm0 = vcmask 261120   ;;  %v1823_v4 = vld [vmem:[#allocation8] ss:$8 sps:$4 sm:$0xff]   ;;  %v2197_v6 = vmov 0   ;;  %v2198_v9 = vmov 0.0   ;;  %v642_v47 = vlaneseq }
 0x103   : > { %2164 = vsyncadd (%p2785_p3), [#allocation15], 4294966784  ;;  %v447_v1 = vmul.f32 %v2575_v0, %v2575_v0  ;;  %v1821_v3 = vld [vmem:[#allocation8 + $0x4] ss:$8 sps:$4 sm:$0xff]   ;;  %v1824_v5 = vld [vmem:[#allocation8 + $0x14] ss:$8 sps:$4 sm:$0xff]   ;;  %522 = vmatprep.mubr.bf16.mxu0 %v2197_v6  ;;  %1599 = vmatprep.subr.bf16.mxu1 %v2198_v9 }
 0x104   : > { %490 = vmatprep.subr.bf16.mxu0 %v1821_v3  ;;  %v1826_v7 = vld [vmem:[#allocation8 + $0x10] ss:$8 sps:$4 sm:$0xff]   ;;  %v1827_v8 = vld [vmem:[#allocation10] sm:$0xff]   ;;  %v1828_v10 = vld [vmem:[#allocation10 + $0x8] sm:$0xff]   ;;  %vm2199_vm1 = vmmov 0   ;;  %vm581_vm2 = vcmask 785408  }
 0x105   : > { %v449_v2 = vsel %vm448_vm0, %v447_v1, 0.0  ;;  %491 = vmatpush1.bf16.msra.mxu0 %v1823_v4  ;;  %1600 = vmatpush3.bf16.msra.mxu1 %v1827_v8  ;;  %v1829_v11 = vld [vmem:[#allocation10 + $0x10] sm:$0xff]   ;;  %v1830_v12 = vld [vmem:[#allocation10 + $0x18] sm:$0xff]   ;;  %v1831_v13 = vld [vmem:[#allocation10 + $0x20] sm:$0xff]   ;;  %s2200_s14 = smov 32   ;;  %s2201_s18 = smov 64  }
 0x106   : > { %450 = vadd.xlane.f32.xlu0 %v449_v2  ;;  %492 = vmatprep.subr.bf16.mxu0 %v1824_v5  ;;  %v1522_v18 = vld [vmem:[#allocation7] ss:$0 sm:$0xff]  ;;  %v1832_v22 = vld [vmem:[#allocation10 + $0x28] sm:$0xff]   ;;  %vm650_vm3 = vcmask 130048   ;;  %v2607_v48 = vshrl.u32 %v642_v47, 7  ;;  %v2609_v49 = vand.u32 127, %v642_v47 }
 0x107   : > { %1601 = vmatprep.subr.bf16.mxu1 %v2198_v9  ;;  %1611 = vmatprep.mubr.msk.bf16.mxu1 %vm2199_vm1, %v2198_v9  ;;  %v626_v23 = vld [vmem:[%s2553_s9] sm:$0xff]  ;;  %v627_v24 = vld [vmem:[%s2553_s9 + $0x8] sm:$0xff]  ;;  %vm699_vm5 = vcmask 64512   ;;  %s2202_s10 = smov 48   ;;  %s2203_s25 = smov 96   ;;  %vm718_vm6 = vcmask 1043456  }
 0x108   : > { %vm646_vm4 = vcmp.le.s32.totalorder %v2609_v49, %v2607_v48  ;;  %s2204_s13 = smov 80   ;;  %s2205_s16 = smov 112   ;;  %vm1092_vm7 = vcmask 392192   ;;  %vm1127_vm8 = vcmask 523264  }
 0x109   : > { %493 = vmatpush1.bf16.msra.mxu0 %v1826_v7  ;;  %1602 = vmatpush3.bf16.msra.mxu1 %v1828_v10  ;;  %s2206_s3 = smov 16   ;;  %s1559_s19 = sshll.u32 %s2274_s11, 7 }
 0x10a   : > { %1615 = vmatprep.subr.bf16.mxu0 %v2198_v9  ;;  %1603 = vmatprep.subr.bf16.mxu1 %v2198_v9  ;;  %s443_s15 = scalar_lea.vmem [#allocation16], %s1513_s20  ;;  %s2700_s12 = scalar_lea.hbm %s2753_s8, %s1559_s19 }
 0x10b   : > { %s1348_s21 = sshll.u32 %s443_s15, 4  ;;  %s1335_s11 = scalar_lea.sflag [#allocation4], %s2541_s4  ;;  %s2702_s21 = int_to_ptr.vmem [resolvable:$true] %s1348_s21 }
 0x10c   : > { %s2097_s20 = scalar_lea.vmem %s2702_s21, 128  ;;  %p2786_p0 = scmp.ne.s32.totalorder %s2771_s2, 0 }
 0x10d   : > { %1604 = vmatpush3.bf16.msra.mxu1 %v1829_v11  ;;  %p2098_p13 = scmp.ne.s32.totalorder %s2702_s21, %s2097_s20  ;;  %s2207_s24 = smov [#allocation16]  }
 0x10e   : > { %1605 = vmatprep.subr.bf16.mxu1 %v2198_v9  ;;  %s2101_s9 = sshll.u32 %s2207_s24, 4  ;;  %s2102_s9 = int_to_ptr.vmem [resolvable:$false] %s2101_s9 }
 0x10f   : > { %p2099_p10 = pnand %p2098_p13, %p2786_p0  ;;  %p2104_p9 = scmp.lt.s32.totalorder %s2702_s21, %s2102_s9 }
 0x111   : > { %1606 = vmatpush3.bf16.msra.mxu1 %v1830_v12  ;;  %p2100_p11 = pneg %p2099_p10 }
 0x112   : > { %1607 = vmatprep.subr.bf16.mxu1 %v2198_v9 }
 0x115   : > { %1608 = vmatpush3.bf16.msra.mxu1 %v1831_v13 }
 0x116   : > { %1609 = vmatprep.subr.bf16.mxu1 %v2198_v9 }
 0x119   : > { %1610 = vmatpush3.bf16.msra.mxu1 %v1832_v22 }
 0x11a   : > { %1633 = vmatprep.subr.bf16.mxu1 %v2198_v9 }
 0x193   : > { %v451_v14 = vpop.xlane.xlu0 %450 }
 0x194   : > { %v453_v15 = vmul.f32 0.03125, %v451_v14 }
 0x196   : > { %v454_v16 = vadd.f32 1e-06, %v453_v15 }
 0x198   : > { %1843 = vrsqrt.f32 %v454_v16 }
 0x1a2   : > { %v1844_v17 = vpop.eup %1843 }
 0x1a3   : > { %v456_v19 = vmul.f32 %v1844_v17, %v2575_v0 }
 0x1a5   : > { %v461_v20 = vmul.f32 %v1522_v18, %v456_v19 }
 0x1a7   : > { %v462_v21 = vpack.c.bf16 %v461_v20, %v461_v20 }
 0x1a9   : > { %1527 = vmatmul.mubr.msk.bf16.vlgmr.msra.gmra.mrb[0].mxu0 %vm448_vm0, %v462_v21 }
 0x1aa   : > { %1617 = vmatprep.mubr.msk.bf16.mxu0 %vm2199_vm1, %v2198_v9 }
 0x27c   : > { %v524_v25 = vpop.f32.mrb[0].mxu0 }
 0x27d   : > { %v531_v26 = vmul.f32 %v524_v25, %v524_v25  ;;  %v628_v27 = vmul.f32 %v626_v23, %v524_v25  ;;  %v526_v28 = vpop.f32.mrb[1].mxu0 }
 0x27e   : > { %v528_v29 = vpop.f32.mrb[2].mxu0  ;;  %v629_v30 = vmul.f32 %v627_v24, %v526_v28  ;;  %v2617_v57 = vpack.c.bf16 %v526_v28, %v526_v28 }
 0x27f   : > { %v532_v31 = vpack.c.bf16 %v531_v26, %v531_v26  ;;  %632 = vrot.lane.b32.xlu0 %v628_v27, %s2200_s14  ;;  %v529_v32 = vpop.f32.mrb[3].mxu0 }
 0x280   : > { %634 = vrot.lane.b32.xlu1 %v629_v30, %s2200_s14 }
 0x281   : > { %1612 = vmatmul.mubr.msk.bf16.vlgmr.msra.gmra.mrb[0].mxu1 %vm581_vm2, %v532_v31 }
 0x282   : > { %1635 = vmatprep.mubr.msk.bf16.mxu1 %vm2199_vm1, %v2198_v9 }
 0x2f1   : > { %v633_v38 = vpop.permute.xlu0 %632 }
 0x2f2   : > { %v635_v39 = vpop.permute.xlu1 %634 }
 0x2f3   : > { %v636_v40 = vsel %vm448_vm0, %v633_v38, %v635_v39 }
 0x2f4   : > { %v638_v41 = vadd.f32 %v636_v40, %v628_v27 }
 0x354   : > { %v619_v33 = vpop.f32.mrb[0].mxu1 }
 0x355   : > { %v620_v34 = vadd.f32 1e-06, %v619_v33  ;;  %v1613_v35 = vpop.f32.mrb[1].mxu1 }
 0x356   : > { %v622_v36 = vpop.f32.mrb[2].mxu1 }
 0x357   : > { %1845 = vrsqrt.f32 %v620_v34  ;;  %v1614_v37 = vpop.f32.mrb[3].mxu1 }
 0x361   : > { %v1846_v42 = vpop.eup %1845 }
 0x362   : > { %v639_v43 = vmul.f32 %v1846_v42, %v638_v41 }
 0x364   : > { %v640_v44 = vpack.c.bf16 %v639_v43, %v639_v43 }
 0x366   : > { %648 = vrot.lane.b32.xlu1 %v640_v44, %s2201_s18 }
 0x3d8   : > { %v649_v45 = vpop.permute.xlu1 %648 }
 0x3d9   : > { %v655_v46 = vsel %vm650_vm3, %v649_v45, 0 }
 0x3da   : > { %1616 = vmatpush3.bf16.xpose.msra.mxu0 %v655_v46 }
 0x3db   : > { %1621 = vmatprep.subr.bf16.mxu0 %v2198_v9 }
 0x3e1   : > { %1618 = vmatmul.mubr.msk.bf16.vlgmr.msra.gmra.mrb[4].mxu0 %vm650_vm3, %v640_v44 }
 0x3e2   : > { %1623 = vmatprep.mubr.msk.bf16.mxu0 %vm2199_vm1, %v2198_v9 }
 0x4b4   : > { %v691_v50 = vpop.f32.mrb[4].mxu0 }
 0x4b5   : > { %v697_v51 = vmul.f32 0.25, %v691_v50  ;;  %v1619_v52 = vpop.f32.mrb[5].mxu0 }
 0x4b6   : > { %v694_v53 = vpop.f32.mrb[6].mxu0 }
 0x4b7   : > { %v1620_v54 = vpop.f32.mrb[7].mxu0  ;;  %v698_v55 = vsel %vm646_vm4, %v697_v51, -1e+30 }
 0x4b8   : > { %v700_v56 = vsel %vm699_vm5, %v698_v55, -inf }
 0x4b9   : > { %701 = vmax.xlane.f32.xlu1 %v700_v56 }
 0x4ca   : > { %713 = vrot.lane.b32.xlu1 %v2617_v57, %s2201_s18 }
 0x4ce   : > { %866 = vrot.lane.b32.xlu1 %v640_v44, %s2202_s10 }
 0x4d2   : > { %864 = vrot.lane.b32.xlu1 %v640_v44, %s2203_s25 }
 0x4d6   : > { %976 = vrot.lane.b32.xlu1 %v640_v44, %s2204_s13 }
 0x546   : > { %v702_v58 = vpop.xlane.xlu1 %701 }
 0x547   : > { %v703_v59 = vsub.f32 %v698_v55, %v702_v58 }
 0x549   : > { %v704_v60 = vmul.f32 1.442695, %v703_v59 }
 0x54a   : > { %v714_v61 = vpop.permute.xlu1 %713 }
 0x54b   : > { %1847 = vpow2.f32 %v704_v60  ;;  %v720_v62 = vsel %vm718_vm6, %v714_v61, 0 }
 0x54c   : > { %1622 = vmatpush3.bf16.msra.mxu0 %v720_v62  ;;  %1634 = vmatpush3.bf16.msra.mxu1 %v720_v62 }
 0x54d   : > { %1627 = vmatprep.subr.bf16.mxu0 %v2198_v9  ;;  %1645 = vmatprep.subr.bf16.mxu1 %v2198_v9 }
 0x54e   : > { %v867_v6 = vpop.permute.xlu1 %866 }
 0x54f   : > { %v872_v8 = vsel %vm650_vm3, %v867_v6, 0 }
 0x552   : > { %v865_v10 = vpop.permute.xlu1 %864 }
 0x555   : > { %v1848_v63 = vpop.eup %1847 }
 0x556   : > { %v706_v1 = vsel %vm699_vm5, %v1848_v63, 0.0  ;;  %v977_v11 = vpop.permute.xlu1 %976 }
 0x557   : > { %707 = vadd.xlane.f32.xlu0 %v706_v1 }
 0x56d   : > { %762 = vrot.lane.b32.xlu0 %v640_v44, %s2205_s16 }
 0x5e4   : > { %v708_v2 = vpop.xlane.xlu0 %707 }
 0x5e5   : > { %1849 = vrcp.f32 %v708_v2 }
 0x5e8   : > { %v763_v7 = vpop.permute.xlu0 %762 }
 0x5ef   : > { %v1850_v3 = vpop.eup %1849 }
 0x5f0   : > { %v710_v4 = vmul.f32 %v1850_v3, %v1848_v63  ;;  %v1833_v3 = vld [vmem:[#allocation11] sm:$0xff]  }
 0x5f2   : > { %v711_v5 = vpack.c.bf16 %v710_v4, %v710_v4  ;;  %v1834_v4 = vld [vmem:[#allocation11 + $0x8] sm:$0xff]  }
 0x5f4   : > { %1624 = vmatmul.mubr.msk.bf16.vlgmr.msra.gmra.mrb[8].mxu0 %vm699_vm5, %v711_v5  ;;  %v1835_v5 = vld [vmem:[#allocation11 + $0x10] sm:$0xff]  }
 0x5f5   : > { %1628 = vmatpush3.bf16.xpose.msra.mxu0 %v655_v46  ;;  %1629 = vmatprep.mubr.msk.bf16.mxu0 %vm2199_vm1, %v2198_v9 }
 0x5f6   : > { %1639 = vmatprep.subr.bf16.mxu0 %v2198_v9 }
 0x5fc   : > { %1630 = vmatmul.mubr.msk.bf16.vlgmr.msra.gmra.mrb[12].mxu0 %vm650_vm3, %v763_v7 }
 0x5fd   : > { %1640 = vmatpush3.bf16.xpose.msra.mxu0 %v872_v8  ;;  %1641 = vmatprep.mubr.msk.bf16.mxu0 %vm2199_vm1, %v2198_v9 }
 0x5fe   : > { %1651 = vmatprep.subr.bf16.mxu0 %v2198_v9 }
 0x604   : > { %1642 = vmatmul.mubr.msk.bf16.vlgmr.msra.gmra.mrb[16].mxu0 %vm650_vm3, %v865_v10 }
 0x605   : > { %1652 = vmatpush3.bf16.xpose.msra.mxu0 %v872_v8  ;;  %1653 = vmatprep.mubr.msk.bf16.mxu0 %vm2199_vm1, %v2198_v9 }
 0x606   : > { %1663 = vmatprep.subr.bf16.mxu0 %v2198_v9 }
 0x60c   : > { %1654 = vmatmul.mubr.msk.bf16.vlgmr.msra.gmra.mrb[20].mxu0 %vm650_vm3, %v977_v11  ;;  %v1836_v11 = vld [vmem:[#allocation11 + $0x18] sm:$0xff]  }
 0x60d   : > { %1671 = vmatprep.mubr.msk.bf16.mxu0 %vm2199_vm1, %v2198_v9  ;;  %1664 = vmatpush3.bf16.msra.mxu0 %v1833_v3 }
 0x60e   : > { %1665 = vmatprep.subr.bf16.mxu0 %v2198_v9 }
 0x611   : > { %1666 = vmatpush3.bf16.msra.mxu0 %v1834_v4 }
 0x612   : > { %1667 = vmatprep.subr.bf16.mxu0 %v2198_v9 }
 0x615   : > { %1668 = vmatpush3.bf16.msra.mxu0 %v1835_v5 }
 0x616   : > { %1669 = vmatprep.subr.bf16.mxu0 %v2198_v9 }
 0x619   : > { %1670 = vmatpush3.bf16.msra.mxu0 %v1836_v11 }
 0x6c7   : > { %v2642_v12 = vpop.f32.mrb[8].mxu0 }
 0x6c8   : > { %v1625_v13 = vpop.f32.mrb[9].mxu0 }
 0x6c9   : > { %v759_v14 = vpop.f32.mrb[10].mxu0 }
 0x6ca   : > { %v1626_v15 = vpop.f32.mrb[11].mxu0 }
 0x6cf   : > { %v801_v16 = vpop.f32.mrb[12].mxu0 }
 0x6d0   : > { %v807_v17 = vmul.f32 0.25, %v801_v16  ;;  %v1631_v18 = vpop.f32.mrb[13].mxu0 }
 0x6d1   : > { %v804_v19 = vpop.f32.mrb[14].mxu0 }
 0x6d2   : > { %v1632_v20 = vpop.f32.mrb[15].mxu0  ;;  %v808_v21 = vsel %vm646_vm4, %v807_v17, -1e+30 }
 0x6d3   : > { %v809_v22 = vsel %vm699_vm5, %v808_v21, -inf }
 0x6d4   : > { %810 = vmax.xlane.f32.xlu1 %v809_v22 }
 0x6d7   : > { %v908_v23 = vpop.f32.mrb[16].mxu0 }
 0x6d8   : > { %v914_v24 = vmul.f32 0.25, %v908_v23  ;;  %v1643_v25 = vpop.f32.mrb[17].mxu0 }
 0x6d9   : > { %v911_v26 = vpop.f32.mrb[18].mxu0 }
 0x6da   : > { %v1644_v27 = vpop.f32.mrb[19].mxu0  ;;  %v915_v28 = vsel %vm646_vm4, %v914_v24, -1e+30 }
 0x6db   : > { %v916_v29 = vsel %vm699_vm5, %v915_v28, -inf }
 0x6dc   : > { %917 = vmax.xlane.f32.xlu0 %v916_v29 }
 0x6df   : > { %v1015_v30 = vpop.f32.mrb[20].mxu0 }
 0x6e0   : > { %v1021_v31 = vmul.f32 0.25, %v1015_v30  ;;  %v1655_v32 = vpop.f32.mrb[21].mxu0 }
 0x6e1   : > { %v1018_v33 = vpop.f32.mrb[22].mxu0 }
 0x6e2   : > { %v1656_v34 = vpop.f32.mrb[23].mxu0  ;;  %v1022_v35 = vsel %vm646_vm4, %v1021_v31, -1e+30 }
 0x6e3   : > { %v1023_v36 = vsel %vm699_vm5, %v1022_v35, -inf }
 0x6e4   : > { %1024 = vmax.xlane.f32.xlu1 %v1023_v36 }
 0x761   : > { %v811_v37 = vpop.xlane.xlu1 %810 }
 0x762   : > { %v812_v38 = vsub.f32 %v808_v21, %v811_v37 }
 0x764   : > { %v813_v39 = vmul.f32 1.442695, %v812_v38 }
 0x766   : > { %1851 = vpow2.f32 %v813_v39  ;;  %v1548_v39 = vld [vmem:[#allocation7 + $0x1] ss:$0 sm:$0xff] }
 0x769   : > { %v918_v40 = vpop.xlane.xlu0 %917 }
 0x76a   : > { %v919_v41 = vsub.f32 %v915_v28, %v918_v40 }
 0x76c   : > { %v920_v42 = vmul.f32 1.442695, %v919_v41 }
 0x76e   : > { %1853 = vpow2.f32 %v920_v42 }
 0x770   : > { %v1852_v43 = vpop.eup %1851 }
 0x771   : > { %v1025_v44 = vpop.xlane.xlu1 %1024  ;;  %v815_v45 = vsel %vm699_vm5, %v1852_v43, 0.0 }
 0x772   : > { %v1026_v46 = vsub.f32 %v1022_v35, %v1025_v44  ;;  %816 = vadd.xlane.f32.xlu0 %v815_v45  ;;  %v1837_v35 = vld [vmem:[#allocation13] sm:$0xff]   ;;  %v1840_v44 = vld [vmem:[#allocation14 + $0x8] sm:$0xff]  }
 0x773   : > { %v1841_v45 = vld [vmem:[#allocation14 + $0x10] sm:$0xff]  }
 0x774   : > { %v1027_v47 = vmul.f32 1.442695, %v1026_v46  ;;  %v1842_v46 = vld [vmem:[#allocation14 + $0x18] sm:$0xff]  }
 0x776   : > { %1855 = vpow2.f32 %v1027_v47 }
 0x778   : > { %v1854_v48 = vpop.eup %1853 }
 0x779   : > { %v922_v49 = vsel %vm699_vm5, %v1854_v48, 0.0 }
 0x77a   : > { %923 = vadd.xlane.f32.xlu1 %v922_v49 }
 0x780   : > { %v1856_v50 = vpop.eup %1855 }
 0x781   : > { %v1029_v51 = vsel %vm699_vm5, %v1856_v50, 0.0 }
 0x782   : > { %1030 = vadd.xlane.f32.xlu0 %v1029_v51 }
 0x78b   : > { %928 = vrot.lane.b32.xlu1 %v2617_v57, %s2202_s10 }
 0x7ff   : > { %v817_v52 = vpop.xlane.xlu0 %816 }
 0x800   : > { %1857 = vrcp.f32 %v817_v52 }
 0x807   : > { %v924_v53 = vpop.xlane.xlu1 %923 }
 0x808   : > { %1859 = vrcp.f32 %v924_v53 }
 0x80a   : > { %v1858_v54 = vpop.eup %1857 }
 0x80b   : > { %v819_v55 = vmul.f32 %v1858_v54, %v1852_v43  ;;  %v929_v56 = vpop.permute.xlu1 %928  ;;  %v1839_v43 = vld [vmem:[#allocation14] sm:$0xff]  }
 0x80c   : > { %v934_v59 = vsel %vm718_vm6, %v929_v56, 0 }
 0x80d   : > { %v820_v58 = vpack.c.bf16 %v819_v55, %v819_v55 }
 0x80f   : > { %1636 = vmatmul.mubr.msk.bf16.vlgmr.msra.gmra.mrb[4].mxu1 %vm699_vm5, %v820_v58  ;;  %v1031_v60 = vpop.xlane.xlu0 %1030 }
 0x810   : > { %1861 = vrcp.f32 %v1031_v60  ;;  %1646 = vmatpush3.bf16.msra.mxu1 %v934_v59  ;;  %1647 = vmatprep.mubr.msk.bf16.mxu1 %vm2199_vm1, %v2198_v9 }
 0x811   : > { %1657 = vmatprep.subr.bf16.mxu1 %v2198_v9 }
 0x812   : > { %v1860_v57 = vpop.eup %1859 }
 0x813   : > { %v926_v61 = vmul.f32 %v1860_v57, %v1854_v48 }
 0x815   : > { %v927_v62 = vpack.c.bf16 %v926_v61, %v926_v61 }
 0x817   : > { %1648 = vmatmul.mubr.msk.bf16.vlgmr.msra.gmra.mrb[8].mxu1 %vm699_vm5, %v927_v62 }
 0x818   : > { %1658 = vmatpush3.bf16.msra.mxu1 %v934_v59  ;;  %1659 = vmatprep.mubr.msk.bf16.mxu1 %vm2199_vm1, %v2198_v9 }
 0x819   : > { %1675 = vmatprep.subr.bf16.mxu1 %v2198_v9 }
 0x81a   : > { %v1862_v63 = vpop.eup %1861 }
 0x81b   : > { %v1033_v1 = vmul.f32 %v1862_v63, %v1856_v50 }
 0x81d   : > { %v1034_v2 = vpack.c.bf16 %v1033_v1, %v1033_v1 }
 0x81f   : > { %1660 = vmatmul.mubr.msk.bf16.vlgmr.msra.gmra.mrb[12].mxu1 %vm699_vm5, %v1034_v2 }
 0x820   : > { %1679 = vmatprep.mubr.msk.bf16.mxu1 %vm2199_vm1, %v2198_v9  ;;  %1676 = vmatpush3.bf16.msra.mxu1 %v1837_v35 }
 0x821   : > { %1677 = vmatprep.subr.bf16.mxu1 %v2198_v9 }
 0x8e2   : > { %v858_v6 = vpop.f32.mrb[4].mxu1 }
 0x8e3   : > { %v1637_v7 = vpop.f32.mrb[5].mxu1  ;;  %1079 = vrot.lane.b32.xlu0 %v858_v6, %s2206_s3 }
 0x8e4   : > { %v861_v8 = vpop.f32.mrb[6].mxu1 }
 0x8e5   : > { %v1638_v10 = vpop.f32.mrb[7].mxu1 }
 0x8ea   : > { %v970_v13 = vpop.f32.mrb[8].mxu1 }
 0x8eb   : > { %1083 = vrot.lane.b32.xlu1 %v970_v13, %s2200_s14  ;;  %v1649_v14 = vpop.f32.mrb[9].mxu1  ;;  %s2103_s14 = scalar_lea.vmem %s2102_s9, 256 }
 0x8ec   : > { %v973_v15 = vpop.f32.mrb[10].mxu1  ;;  %p2105_p6 = scmp.lt.s32.totalorder %s2103_s14, %s2097_s20 }
 0x8ed   : > { %v1650_v16 = vpop.f32.mrb[11].mxu1 }
 0x8ee   : > { %p2106_p2 = por %p2105_p6, %p2104_p9 }
 0x8f0   : > { %p2107_p8 = pnand %p2106_p2, %p2100_p11 }
 0x8f2   : > { %v1072_v17 = vpop.f32.mrb[12].mxu1 }
 0x8f3   : > { %1087 = vrot.lane.b32.xlu1 %v1072_v17, %s2202_s10  ;;  %v1661_v18 = vpop.f32.mrb[13].mxu1 }
 0x8f4   : > { %v1075_v19 = vpop.f32.mrb[14].mxu1 }
 0x8f5   : > { %v1662_v20 = vpop.f32.mrb[15].mxu1 }
 0x955   : > { %v1080_v21 = vpop.permute.xlu0 %1079 }
 0x956   : > { %v1090_v23 = vsel %vm650_vm3, %v2642_v12, %v1080_v21  ;;  %v1838_v12 = vld [vmem:[#allocation13 + $0x8] sm:$0xff]  }
 0x957   : > { %1678 = vmatpush3.bf16.msra.mxu1 %v1838_v12 }
 0x958   : > { %1683 = vmatprep.subr.bf16.mxu1 %v2198_v9 }
 0x95d   : > { %v1084_v22 = vpop.permute.xlu1 %1083 }
 0x95e   : > { %v1091_v24 = vsel %vm448_vm0, %v1090_v23, %v1084_v22 }
 0x965   : > { %v1088_v25 = vpop.permute.xlu1 %1087 }
 0x966   : > { %v1093_v26 = vsel %vm1092_vm7, %v1091_v24, %v1088_v25 }
 0x967   : > { %v1094_v27 = vpack.c.bf16 %v1093_v26, %v1093_v26 }
 0x969   : > { %1672 = vmatmul.mubr.msk.bf16.vlgmr.msra.gmra.mrb[24].mxu0 %vm1127_vm8, %v1094_v27 }
 0xa3c   : > { %v1165_v28 = vpop.f32.mrb[24].mxu0 }
 0xa3d   : > { %v1166_v29 = vadd.f32 %v1165_v28, %v2575_v0  ;;  %v1673_v30 = vpop.f32.mrb[25].mxu0 }
 0xa3e   : > { %v1168_v31 = vpop.f32.mrb[26].mxu0 }
 0xa3f   : > { %v1674_v32 = vpop.f32.mrb[27].mxu0  ;;  %v1172_v33 = vmul.f32 %v1166_v29, %v1166_v29 }
 0xa41   : > { %v1173_v34 = vsel %vm448_vm0, %v1172_v33, 0.0 }
 0xa42   : > { %1174 = vadd.xlane.f32.xlu0 %v1173_v34 }
 0xacf   : > { %v1175_v36 = vpop.xlane.xlu0 %1174 }
 0xad0   : > { %v1176_v37 = vmul.f32 0.03125, %v1175_v36 }
 0xad2   : > { %v1177_v38 = vadd.f32 1e-06, %v1176_v37 }
 0xad4   : > { %1863 = vrsqrt.f32 %v1177_v38 }
 0xade   : > { %v1864_v0 = vpop.eup %1863 }
 0xadf   : > { %v1179_v40 = vmul.f32 %v1864_v0, %v1166_v29 }
 0xae1   : > { %v1184_v41 = vmul.f32 %v1548_v39, %v1179_v40 }
 0xae3   : > { %v1185_v42 = vpack.c.bf16 %v1184_v41, %v1184_v41 }
 0xae5   : > { %1680 = vmatmul.mubr.msk.bf16.vlgmr.msra.gmra.mrb[16].mxu1 %vm448_vm0, %v1185_v42 }
 0xae6   : > { %1691 = vmatprep.mubr.msk.bf16.mxu1 %vm2199_vm1, %v2198_v9  ;;  %1684 = vmatpush3.bf16.msra.mxu1 %v1839_v43 }
 0xae7   : > { %1685 = vmatprep.subr.bf16.mxu1 %v2198_v9 }
 0xaea   : > { %1686 = vmatpush3.bf16.msra.mxu1 %v1840_v44 }
 0xaeb   : > { %1687 = vmatprep.subr.bf16.mxu1 %v2198_v9 }
 0xaee   : > { %1688 = vmatpush3.bf16.msra.mxu1 %v1841_v45 }
 0xaef   : > { %1689 = vmatprep.subr.bf16.mxu1 %v2198_v9 }
 0xaf2   : > { %1690 = vmatpush3.bf16.msra.mxu1 %v1842_v46 }
 0xbb8   : > { %v1239_v47 = vpop.f32.mrb[16].mxu1 }
 0xbb9   : > { %1253 = vrot.lane.b32.xlu1 %v1239_v47, %s2201_s18  ;;  %v1681_v48 = vpop.f32.mrb[17].mxu1  ;;  %v1552_v51 = vmul.f32 -1.442695, %v1239_v47 }
 0xbba   : > { %v1242_v49 = vpop.f32.mrb[18].mxu1 }
 0xbbb   : > { %v1682_v50 = vpop.f32.mrb[19].mxu1  ;;  %1865 = vpow2.f32 %v1552_v51 }
 0xbc5   : > { %v1866_v52 = vpop.eup %1865 }
 0xbc6   : > { %v1248_v53 = vadd.f32 1.0, %v1866_v52 }
 0xbc8   : > { %1867 = vrcp.f32 %v1248_v53 }
 0xbd2   : > { %v1868_v54 = vpop.eup %1867 }
 0xbd3   : > { %v1251_v55 = vmul.f32 %v1868_v54, %v1239_v47 }
 0xc2b   : > { %v1254_v56 = vpop.permute.xlu1 %1253 }
 0xc2c   : > { %v1256_v9 = vmul.f32 %v1254_v56, %v1251_v55 }
 0xc2e   : > { %v1257_v58 = vpack.c.bf16 %v1256_v9, %v1256_v9 }
 0xc30   : > { %1692 = vmatmul.mubr.msk.bf16.vlgmr.msra.gmra.mrb[20].mxu1 %vm1127_vm8, %v1257_v58 }
 0xd03   : > { %v1327_v59 = vpop.f32.mrb[20].mxu1 }
 0xd04   : > { %v1328_v60 = vadd.f32 %v1327_v59, %v1166_v29  ;;  %v1693_v57 = vpop.f32.mrb[21].mxu1 }
 0xd05   : > { %v1330_v61 = vpop.f32.mrb[22].mxu1 }
 0xd06   : > { %v1694_v62 = vpop.f32.mrb[23].mxu1  ;;  %1333 = vst.msk [vmem:[%s443_s15] sm:$0xff] %vm448_vm0, %v1328_v60 }
 0xd07   : > { %2110 = shalt.err (!%p2107_p8)
}
 0xd08   : > { %s2111_s4 = scalar_lea.hbm %s2700_s12, 128  ;;  %s2115_s25 = scalar_lea.hbm %s2753_s8, 256 }
 0xd09   : > { %p2112_p12 = scmp.ne.s32.totalorder %s2700_s12, %s2111_s4  ;;  %p2116_p4 = scmp.lt.u32.totalorder %s2700_s12, %s2753_s8 }
 0xd0a   : > { %p2117_p1 = scmp.lt.u32.totalorder %s2115_s25, %s2111_s4  ;;  %p2119_p13 = scmp.lt.u32.totalorder %s2111_s4, %s2700_s12 }
 0xd0b   : > { %p2113_p5 = pnand %p2112_p12, %p2786_p0 }
 0xd0c   : > { %p2118_p3 = por %p2117_p1, %p2116_p4 }
 0xd0d   : > { %p2114_p7 = pneg %p2113_p5 }
 0xd0e   : > { %p2120_p10 = por %p2119_p13, %p2118_p3 }
 0xd10   : > { %p2121_p11 = pnand %p2120_p10, %p2114_p7 }
 0xd12   : > { %2124 = shalt.err (!%p2121_p11)
}
 0xd13   : > { %1723 = dma.vmem_to_hbm [thread:$0]  (%p2786_p0), %s2702_s21, 128, %s2700_s12, %s1335_s11  }
 0xd14 PF: > { %s1360_s3 = sand.u32 1, %s2171_s27   ;;  %p2787_p9 = scmp.ne.s32.totalorder %s2772_s26, 0 }
 0xd15   : > { %p2788_p6 = scmp.ge.s32.totalorder %s2183_s30, 2  ;;  %s1361_s19 = scalar_lea.sflag [#allocation4], %s1360_s3 }
 0xd17   : > { %p1752_p2 = pnand %p2788_p6, %p2787_p9 }
 0xd19   : > { %2166 = dma.done.wait (!%p1752_p2), %s1361_s19, 128  }
 0xd1a   : > { %2168 = vsyncadd (!%p1752_p2), %s1361_s19, 4294967168  ;;  %p27_p8 = scmp.ge.s32.totalorder %s2430_s23, 4   ;;  %s2789_s27 = smov %s2175_s28 }
 0xd1b   : > { %s2790_s28 = smov %s2179_s29  ;;  %s2791_s29 = smov %s2441_s17 }
 0xd1c   : > { %s2792_s30 = smov %s2430_s23  ;;  %29 = sbr.rel (!%p27_p8) target bundleno = 15 (0xf), region = 134 }
 0xd23   :  { %1366 = vsyncpa [#allocation3], 1 }
 0xd24   :  { %1368 = vsyncpa [#allocation3 + $0x1], 1 }
 0xd25   :  { %1369 = vsyncpa [#allocation6], 1 }
 0xd26   :  { %1371 = vsyncpa [#allocation6 + $0x1], 1 }
 0xd27   :  { %1372 = vsyncpa [#allocation9], 1 }
 0xd28   :  { %1373 = vsyncpa [#allocation12], 1 }
 0xd29   :  { %1374 = vsyncpa [#allocation15], 1 }
 0xd2a   :  { %1375 = vsyncpa [#allocation4], 1 }
 0xd2b   :  { %1377 = vsyncpa [#allocation4 + $0x1], 1 }

</bundles_post_ra>
